<compile_context>
chip_gen: v6e
topology: v6e:2x2x1
jax: 0.10.0
libtpu: 0.0.40
codegen_flags: <defaults>
</compile_context>

<pallas_src>
import functools

import jax
import jax.numpy as jnp
from jax import lax
from jax.experimental import pallas as pl
from jax.experimental.pallas import tpu as pltpu

_EPS = 1e-5  # BatchNorm1d default eps


def _sdn_kernel(x_ref, p_ref, out_ref, xh, cres, sacc, qacc, bnc, *,
                B, L, Lt, D, K, n_tiles, ragged, n_tail, H0):
    ph = pl.program_id(0)
    t = pl.program_id(1)
    f32 = jnp.float32
    base = t * Lt

    inv_n1 = 1.0 / float(B * (L + K + 1))   # BN1: untruncated conv length
    inv_n2 = 1.0 / float(B * L)             # BN2: truncated length

    # ---- packed per-channel parameters, columns hoisted once ----------------
    Pv = p_ref[...]                                   # (D, K + D + 8)
    col = lambda j: Pv[:, j:j + 1][None]              # -> (1, D, 1)
    taps = [col(k) for k in range(K)]                 # encoder folded into taps
    spb = col(K)
    g1c, b1c = col(K + 1), col(K + 2)
    ftw = [col(K + 3 + d) for d in range(D)]
    ftbc = col(K + 3 + D)
    g2c, b2c = col(K + 4 + D), col(K + 5 + D)
    decw, decb = col(K + 6 + D), col(K + 7 + D)       # decb holds dec_b / D

    def feature(v):                                   # 1x1 conv across sublanes (VPU)
        acc = jnp.zeros(v.shape, f32) + ftbc
        for d in range(D):
            acc = acc + v[:, d:d + 1, :] * ftw[d]
        return acc

    def bsum(v):                                      # reduce batch axis only
        return jnp.sum(v, axis=0, keepdims=True)

    def chan_sum(v):                                  # -> (1, D, 1)
        return jnp.sum(jnp.sum(v, axis=2, keepdims=True), axis=0, keepdims=True)

    def finalize(s, q, inv_n, gc, bc, row):           # hoisted BN scale/shift
        mean = s * inv_n
        var = q * inv_n - mean * mean
        sc = lax.rsqrt(var + _EPS) * gc
        bnc[row:row + 1] = sc
        bnc[row + 1:row + 2] = bc - mean * sc

    # ================= phase 0: depthwise conv + BN1 statistics ==============
    @pl.when(jnp.logical_and(ph == 0, t == 0))
    def _():
        xh[...] = jnp.zeros_like(xh)                  # left/right zero padding
        sacc[...] = jnp.zeros_like(sacc)
        qacc[...] = jnp.zeros_like(qacc)

    @pl.when(jnp.logical_and(ph == 0, t > 0))
    def _():                                          # carry last K inputs of prev tile
        xh[:, :, H0 - K:H0] = xh[:, :, H0 + Lt - K:H0 + Lt]

    @pl.when(ph == 0)
    def _():
        xt = x_ref[...]                               # (B, Lt), only HBM read of x
        if ragged:                                    # zero lanes past L
            gx = base + lax.broadcasted_iota(jnp.int32, (1, Lt), 1)
            xt = jnp.where(gx < L, xt, 0.0)
        # pre-broadcast across the D sublanes once per tile
        xh[:, :, H0:H0 + Lt] = jnp.broadcast_to(xt[:, None, :], (B, D, Lt))

        acc = jnp.zeros((B, D, Lt), f32) + spb        # conv[j] = sum_k w[k]*x[j+k-K]+b
        for k in range(K):
            acc = acc + xh[:, :, H0 - K + k:H0 - K + k + Lt] * taps[k]
        cres[t] = acc                                 # cache untruncated conv

        v = acc
        if ragged:                                    # BN1 counts positions < L+K+1
            gv = base + lax.broadcasted_iota(jnp.int32, (1, 1, Lt), 2)
            v = jnp.where(gv < L + K + 1, acc, 0.0)
        sacc[...] += bsum(v)
        qacc[...] += bsum(v * v)

    @pl.when(jnp.logical_and(ph == 0, t == n_tiles - 1))
    def _():
        s, q = chan_sum(sacc[...]), chan_sum(qacc[...])
        if n_tail > 0:                                # conv tail not covered by tiles
            tl = jnp.zeros((B, D, n_tail), f32) + spb
            for k in range(K):
                i0 = H0 + Lt - K + k
                tl = tl + xh[:, :, i0:i0 + n_tail] * taps[k]
            s = s + chan_sum(tl)
            q = q + chan_sum(tl * tl)
        finalize(s, q, inv_n1, g1c, b1c, 0)

    # ============ phase 1: BN1 apply + 1x1 conv + BN2 statistics =============
    @pl.when(jnp.logical_and(ph == 1, t == 0))
    def _():
        sacc[...] = jnp.zeros_like(sacc)
        qacc[...] = jnp.zeros_like(qacc)

    @pl.when(ph == 1)
    def _():
        x1 = jnp.maximum(cres[t] * bnc[0:1] + bnc[1:2], 0.0)
        cres[t] = x1                                  # cache x1 for phase 2 (in place)
        y = feature(x1)
        v = y
        if ragged:                                    # BN2 counts positions < L
            gv = base + lax.broadcasted_iota(jnp.int32, (1, 1, Lt), 2)
            v = jnp.where(gv < L, y, 0.0)
        sacc[...] += bsum(v)
        qacc[...] += bsum(v * v)

    @pl.when(jnp.logical_and(ph == 1, t == n_tiles - 1))
    def _():
        finalize(chan_sum(sacc[...]), chan_sum(qacc[...]), inv_n2, g2c, b2c, 2)

    # ============ phase 2: BN2 apply + residual + ReLU + decode ===============
    @pl.when(ph == 2)
    def _():
        x1 = cres[t]
        y = feature(x1)
        x2 = jnp.maximum(y * bnc[2:3] + bnc[3:4] + x1, 0.0)
        out_ref[...] = jnp.sum(x2 * decw + decb, axis=1)     # lane-dense (B, Lt)


def _pack_params(params, D, K):
    """Pack all per-channel vectors into one (D, K + D + 8) slab (channels = sublanes)."""
    weff = params["enc_w"][:, None] * params["sp_w"]          # encoder folded into taps
    cols = [
        weff,                                                  # 0 .. K-1
        params["sp_b"][:, None],                               # K
        params["sp_g"][:, None], params["sp_be"][:, None],     # K+1, K+2
        params["ft_w"],                                        # K+3 .. K+2+D
        params["ft_b"][:, None],                               # K+3+D
        params["ft_g"][:, None], params["ft_be"][:, None],     # K+4+D, K+5+D
        params["dec_w"][:, None],                              # K+6+D
        jnp.broadcast_to(params["dec_b"] / D, (D,))[:, None],  # K+7+D  (dec_b / D)
    ]
    return jnp.concatenate(cols, axis=1).astype(jnp.float32)


def _vmem_need_bytes(B, D, Lt, n_tiles):
    f = 4
    cache = f * n_tiles * B * D * Lt        # resident conv / x1 cache
    halo = f * B * D * (Lt + 256)           # halo'd staging buffer
    accs = 2 * f * D * Lt                   # BN partial-sum accumulators
    temps = 8 * f * B * D * Lt              # rough in-flight temporaries
    io = 2 * 2 * f * B * Lt                 # double-buffered x / out tiles
    return cache + halo + accs + temps + io


def _pick_tile(B, D, L, budget_bytes=36 * 1024 * 1024):
    if L <= 256:
        if _vmem_need_bytes(B, D, L, 1) > budget_bytes:
            raise ValueError("SDN Pallas kernel: shape too large for VMEM-resident plan")
        return L, 1
    for cand in (4096, 2048, 1024, 512, 256, 128):
        if cand > L:
            continue
        n_t = -(-L // cand)
        if _vmem_need_bytes(B, D, cand, n_t) <= budget_bytes:
            return cand, n_t
    raise ValueError("SDN Pallas kernel: sequence too large for VMEM-resident plan")


def sdn_forward(x, params, *, d_model=8, kernel_size=8, tile=None):
    """x: (B, 1, L) float32 (PyTorch NCL).  Returns (B, L) float32."""
    B, c_in, L = x.shape
    assert c_in == 1
    D, K = d_model, kernel_size

    if tile is not None:
        Lt = int(tile)
        n_tiles = -(-L // Lt)
        assert n_tiles == 1 or Lt % 128 == 0, "tile must be a multiple of 128 when tiling"
    else:
        Lt, n_tiles = _pick_tile(B, D, L)

    ragged = (L % Lt) != 0
    n_tail = max(0, L + K + 1 - n_tiles * Lt)       # untruncated-conv tail positions
    H0 = max(128, ((K + 127) // 128) * 128)         # halo offset inside staging buffer
    XHW = 2 * H0 + Lt

    x2d = x.reshape(B, L).astype(jnp.float32)       # channel dim is 1 -> free reshape
    P = _pack_params(params, D, K)
    R = K + D + 8

    kernel = functools.partial(_sdn_kernel, B=B, L=L, Lt=Lt, D=D, K=K,
                               n_tiles=n_tiles, ragged=ragged, n_tail=n_tail, H0=H0)
    return pl.pallas_call(
        kernel,
        out_shape=jax.ShapeDtypeStruct((B, L), jnp.float32),
        grid=(3, n_tiles),
        in_specs=[
            # x only streams in phase 0; constant block afterwards -> no re-DMA
            pl.BlockSpec((B, Lt), lambda p, t: (0, jnp.where(p == 0, t, 0))),
            pl.BlockSpec((D, R), lambda p, t: (0, 0)),       # packed params, fetched once
        ],
        # output stays VMEM-resident during the stats phases; per-tile only in phase 2
        out_specs=pl.BlockSpec((B, Lt), lambda p, t: (0, jnp.where(p == 2, t, 0))),
        scratch_shapes=[
            pltpu.VMEM((B, D, XHW), jnp.float32),            # halo'd, sublane-broadcast x
            pltpu.VMEM((n_tiles, B, D, Lt), jnp.float32),    # resident conv -> x1 cache
            pltpu.VMEM((1, D, Lt), jnp.float32),             # BN partial sums
            pltpu.VMEM((1, D, Lt), jnp.float32),             # BN partial sums of squares
            pltpu.VMEM((4, D, 1), jnp.float32),              # BN1/BN2 scale & shift
        ],
        compiler_params=pltpu.CompilerParams(
            # sequential tiles required by global-BN accumulation + halo carry
            dimension_semantics=("arbitrary", "arbitrary"),
            vmem_limit_bytes=48 * 1024 * 1024,
        ),
    )(x2d, P)


def init_params(key, d_model=8, kernel_size=8):
    D, K = d_model, kernel_size
    ks = jax.random.split(key, 12)
    n = lambda k, s, sc: (sc * jax.random.normal(k, s, jnp.float32))
    return {
        "enc_w": n(ks[0], (D,), 1.0),                  # Conv1d(1, D, 1, bias=False)
        "sp_w": n(ks[1], (D, K), 1.0 / K ** 0.5),      # depthwise Conv1d weight (D,1,K)
        "sp_b": n(ks[2], (D,), 0.1),
        "sp_g": 1.0 + n(ks[3], (D,), 0.1),             # BN1 gamma
        "sp_be": n(ks[4], (D,), 0.1),                  # BN1 beta
        "ft_w": n(ks[5], (D, D), 1.0 / D ** 0.5),      # Conv1d(D, D, 1).weight (out,in)
        "ft_b": n(ks[6], (D,), 0.1),
        "ft_g": 1.0 + n(ks[7], (D,), 0.1),
        "ft_be": n(ks[8], (D,), 0.1),
        "dec_w": n(ks[9], (D,), 1.0 / D ** 0.5),       # Conv1d(D, 1, 1).weight
        "dec_b": n(ks[10], (1,), 0.1),
    }


def sdn_reference(x, params, *, d_model=8, kernel_size=8):
    """Independent pure-JAX reference mirroring the PyTorch forward (training-mode BN)."""
    D, K = d_model, kernel_size
    L = x.shape[-1]
    h = params["enc_w"][None, :, None] * x                               # (B, D, L)
    conv = lax.conv_general_dilated(
        h, params["sp_w"].reshape(D, 1, K), window_strides=(1,),
        padding=[(K, K)], feature_group_count=D,
        dimension_numbers=("NCH", "OIH", "NCH"))
    conv = conv + params["sp_b"][None, :, None]

    def bn(t, g, b):
        m = t.mean(axis=(0, 2), keepdims=True)
        v = ((t - m) ** 2).mean(axis=(0, 2), keepdims=True)
        return (t - m) / jnp.sqrt(v + _EPS) * g[None, :, None] + b[None, :, None]

    x1 = jnp.maximum(bn(conv, params["sp_g"], params["sp_be"])[..., :L], 0.0)
    y = jnp.einsum("cd,bdl->bcl", params["ft_w"], x1) + params["ft_b"][None, :, None]
    x2 = jnp.maximum(bn(y, params["ft_g"], params["ft_be"]) + x1, 0.0)
    out = jnp.einsum("d,bdl->bl", params["dec_w"], x2) + params["dec_b"]
    return out


if __name__ == "__main__":
    key = jax.random.PRNGKey(0)
    kx, kp, kx2, kx3 = jax.random.split(key, 4)
    D, K = 8, 8                      # module defaults: d_model=8, kernel_size=8, n_layers=1

    params = init_params(kp, D, K)

    # small shape consistent with the module: (B, 1, L), single tile + conv-tail branch
    B, L = 2, 16
    x = jax.random.normal(kx, (B, 1, L), jnp.float32)
    out = jax.block_until_ready(sdn_forward(x, params, d_model=D, kernel_size=K))
    ref = sdn_reference(x, params, d_model=D, kernel_size=K)
    assert out.shape == (B, L), out.shape
    err = float(jnp.max(jnp.abs(out - ref)))
    assert err < 5e-4, f"mismatch vs reference (single tile): {err}"

    # multi-tile RAGGED path (L=384 -> two 256-lane tiles, masked last tile + halo carry)
    B2, L2 = 2, 384
    x2 = jax.random.normal(kx2, (B2, 1, L2), jnp.float32)
    out2 = jax.block_until_ready(sdn_forward(x2, params, d_model=D, kernel_size=K))
    ref2 = sdn_reference(x2, params, d_model=D, kernel_size=K)
    err2 = float(jnp.max(jnp.abs(out2 - ref2)))
    assert err2 < 5e-4, f"mismatch vs reference (ragged tiled): {err2}"

    # multi-tile DIVISIBLE path (L=512 forced to 256-lane tiles: carry + tail branch)
    B3, L3 = 2, 512
    x3 = jax.random.normal(kx3, (B3, 1, L3), jnp.float32)
    out3 = jax.block_until_ready(sdn_forward(x3, params, d_model=D, kernel_size=K, tile=256))
    ref3 = sdn_reference(x3, params, d_model=D, kernel_size=K)
    err3 = float(jnp.max(jnp.abs(out3 - ref3)))
    assert err3 < 5e-4, f"mismatch vs reference (divisible tiled): {err3}"

    print("KERNEL_OK")
</pallas_src>

<mosaic_0001>
module attributes {stable_mosaic.version = 11 : i64} {
  func.func @_sdn_kernel(%arg0: i32, %arg1: i32, %arg2: memref<2x16xf32, #tpu.memory_space<vmem>>, %arg3: memref<8x24xf32, #tpu.memory_space<vmem>>, %arg4: memref<2x16xf32, #tpu.memory_space<vmem>>, %arg5: memref<2x8x272xf32, #tpu.memory_space<vmem>>, %arg6: memref<1x2x8x16xf32, #tpu.memory_space<vmem>>, %arg7: memref<1x8x16xf32, #tpu.memory_space<vmem>>, %arg8: memref<1x8x16xf32, #tpu.memory_space<vmem>>, %arg9: memref<4x8x1xf32, #tpu.memory_space<vmem>>) attributes {dimension_semantics = [#tpu.dimension_semantics<arbitrary>, #tpu.dimension_semantics<arbitrary>], iteration_bounds = array<i64: 3, 1>, scalar_prefetch = 0 : i64, scratch_operands = 5 : i64, tpu.core_type = #tpu.core_type<tc>, window_params = [{transform_indices = @transform_0, window_bounds = array<i64: 2, 16>}, {pipeline_mode = #tpu.pipeline_mode<synchronous>, transform_indices = @transform_1, window_bounds = array<i64: 8, 24>}, {transform_indices = @transform_2, window_bounds = array<i64: 2, 16>}]} {
    %c0 = arith.constant 0 : index
    %c0_0 = arith.constant 0 : index
    %0 = vector.load %arg3[%c0, %c0_0] : memref<8x24xf32, #tpu.memory_space<vmem>>, vector<8x24xf32>
    %1 = vector.extract_strided_slice %0 {offsets = [0, 0], sizes = [8, 1], strides = [1, 1]} : vector<8x24xf32> to vector<8x1xf32>
    %2 = vector.shape_cast %1 : vector<8x1xf32> to vector<1x8x1xf32>
    %3 = vector.extract_strided_slice %0 {offsets = [0, 1], sizes = [8, 1], strides = [1, 1]} : vector<8x24xf32> to vector<8x1xf32>
    %4 = vector.shape_cast %3 : vector<8x1xf32> to vector<1x8x1xf32>
    %5 = vector.extract_strided_slice %0 {offsets = [0, 2], sizes = [8, 1], strides = [1, 1]} : vector<8x24xf32> to vector<8x1xf32>
    %6 = vector.shape_cast %5 : vector<8x1xf32> to vector<1x8x1xf32>
    %7 = vector.extract_strided_slice %0 {offsets = [0, 3], sizes = [8, 1], strides = [1, 1]} : vector<8x24xf32> to vector<8x1xf32>
    %8 = vector.shape_cast %7 : vector<8x1xf32> to vector<1x8x1xf32>
    %9 = vector.extract_strided_slice %0 {offsets = [0, 4], sizes = [8, 1], strides = [1, 1]} : vector<8x24xf32> to vector<8x1xf32>
    %10 = vector.shape_cast %9 : vector<8x1xf32> to vector<1x8x1xf32>
    %11 = vector.extract_strided_slice %0 {offsets = [0, 5], sizes = [8, 1], strides = [1, 1]} : vector<8x24xf32> to vector<8x1xf32>
    %12 = vector.shape_cast %11 : vector<8x1xf32> to vector<1x8x1xf32>
    %13 = vector.extract_strided_slice %0 {offsets = [0, 6], sizes = [8, 1], strides = [1, 1]} : vector<8x24xf32> to vector<8x1xf32>
    %14 = vector.shape_cast %13 : vector<8x1xf32> to vector<1x8x1xf32>
    %15 = vector.extract_strided_slice %0 {offsets = [0, 7], sizes = [8, 1], strides = [1, 1]} : vector<8x24xf32> to vector<8x1xf32>
    %16 = vector.shape_cast %15 : vector<8x1xf32> to vector<1x8x1xf32>
    %17 = vector.extract_strided_slice %0 {offsets = [0, 8], sizes = [8, 1], strides = [1, 1]} : vector<8x24xf32> to vector<8x1xf32>
    %18 = vector.shape_cast %17 : vector<8x1xf32> to vector<1x8x1xf32>
    %19 = vector.extract_strided_slice %0 {offsets = [0, 9], sizes = [8, 1], strides = [1, 1]} : vector<8x24xf32> to vector<8x1xf32>
    %20 = vector.shape_cast %19 : vector<8x1xf32> to vector<1x8x1xf32>
    %21 = vector.extract_strided_slice %0 {offsets = [0, 10], sizes = [8, 1], strides = [1, 1]} : vector<8x24xf32> to vector<8x1xf32>
    %22 = vector.shape_cast %21 : vector<8x1xf32> to vector<1x8x1xf32>
    %23 = vector.extract_strided_slice %0 {offsets = [0, 11], sizes = [8, 1], strides = [1, 1]} : vector<8x24xf32> to vector<8x1xf32>
    %24 = vector.shape_cast %23 : vector<8x1xf32> to vector<1x8x1xf32>
    %25 = vector.extract_strided_slice %0 {offsets = [0, 12], sizes = [8, 1], strides = [1, 1]} : vector<8x24xf32> to vector<8x1xf32>
    %26 = vector.shape_cast %25 : vector<8x1xf32> to vector<1x8x1xf32>
    %27 = vector.extract_strided_slice %0 {offsets = [0, 13], sizes = [8, 1], strides = [1, 1]} : vector<8x24xf32> to vector<8x1xf32>
    %28 = vector.shape_cast %27 : vector<8x1xf32> to vector<1x8x1xf32>
    %29 = vector.extract_strided_slice %0 {offsets = [0, 14], sizes = [8, 1], strides = [1, 1]} : vector<8x24xf32> to vector<8x1xf32>
    %30 = vector.shape_cast %29 : vector<8x1xf32> to vector<1x8x1xf32>
    %31 = vector.extract_strided_slice %0 {offsets = [0, 15], sizes = [8, 1], strides = [1, 1]} : vector<8x24xf32> to vector<8x1xf32>
    %32 = vector.shape_cast %31 : vector<8x1xf32> to vector<1x8x1xf32>
    %33 = vector.extract_strided_slice %0 {offsets = [0, 16], sizes = [8, 1], strides = [1, 1]} : vector<8x24xf32> to vector<8x1xf32>
    %34 = vector.shape_cast %33 : vector<8x1xf32> to vector<1x8x1xf32>
    %35 = vector.extract_strided_slice %0 {offsets = [0, 17], sizes = [8, 1], strides = [1, 1]} : vector<8x24xf32> to vector<8x1xf32>
    %36 = vector.shape_cast %35 : vector<8x1xf32> to vector<1x8x1xf32>
    %37 = vector.extract_strided_slice %0 {offsets = [0, 18], sizes = [8, 1], strides = [1, 1]} : vector<8x24xf32> to vector<8x1xf32>
    %38 = vector.shape_cast %37 : vector<8x1xf32> to vector<1x8x1xf32>
    %39 = vector.extract_strided_slice %0 {offsets = [0, 19], sizes = [8, 1], strides = [1, 1]} : vector<8x24xf32> to vector<8x1xf32>
    %40 = vector.shape_cast %39 : vector<8x1xf32> to vector<1x8x1xf32>
    %41 = vector.extract_strided_slice %0 {offsets = [0, 20], sizes = [8, 1], strides = [1, 1]} : vector<8x24xf32> to vector<8x1xf32>
    %42 = vector.shape_cast %41 : vector<8x1xf32> to vector<1x8x1xf32>
    %43 = vector.extract_strided_slice %0 {offsets = [0, 21], sizes = [8, 1], strides = [1, 1]} : vector<8x24xf32> to vector<8x1xf32>
    %44 = vector.shape_cast %43 : vector<8x1xf32> to vector<1x8x1xf32>
    %45 = vector.extract_strided_slice %0 {offsets = [0, 22], sizes = [8, 1], strides = [1, 1]} : vector<8x24xf32> to vector<8x1xf32>
    %46 = vector.shape_cast %45 : vector<8x1xf32> to vector<1x8x1xf32>
    %47 = vector.extract_strided_slice %0 {offsets = [0, 23], sizes = [8, 1], strides = [1, 1]} : vector<8x24xf32> to vector<8x1xf32>
    %48 = vector.shape_cast %47 : vector<8x1xf32> to vector<1x8x1xf32>
    %c0_i32 = arith.constant 0 : i32
    %49 = arith.cmpi eq, %arg0, %c0_i32 : i32
    %c0_i32_1 = arith.constant 0 : i32
    %50 = arith.cmpi eq, %arg1, %c0_i32_1 : i32
    %51 = arith.andi %49, %50 : i1
    %52 = arith.extui %51 : i1 to i32
    %c0_i32_2 = arith.constant 0 : i32
    %53 = arith.cmpi ne, %52, %c0_i32_2 : i32
    scf.if %53 {
      %cst = arith.constant 0.000000e+00 : f32
      %83 = vector.broadcast %cst : f32 to vector<2x8x272xf32>
      %c0_19 = arith.constant 0 : index
      %c0_20 = arith.constant 0 : index
      %c0_21 = arith.constant 0 : index
      %84 = vector.load %arg5[%c0_19, %c0_20, %c0_21] : memref<2x8x272xf32, #tpu.memory_space<vmem>>, vector<2x8x272xf32>
      tpu.vector_store %arg5[%c0_19, %c0_20, %c0_21], %83 {strides = array<i32>} : memref<2x8x272xf32, #tpu.memory_space<vmem>>, vector<2x8x272xf32>,
      %cst_22 = arith.constant 0.000000e+00 : f32
      %85 = vector.broadcast %cst_22 : f32 to vector<1x8x16xf32>
      %c0_23 = arith.constant 0 : index
      %c0_24 = arith.constant 0 : index
      %c0_25 = arith.constant 0 : index
      %86 = vector.load %arg7[%c0_23, %c0_24, %c0_25] : memref<1x8x16xf32, #tpu.memory_space<vmem>>, vector<1x8x16xf32>
      tpu.vector_store %arg7[%c0_23, %c0_24, %c0_25], %85 {strides = array<i32>} : memref<1x8x16xf32, #tpu.memory_space<vmem>>, vector<1x8x16xf32>,
      %cst_26 = arith.constant 0.000000e+00 : f32
      %87 = vector.broadcast %cst_26 : f32 to vector<1x8x16xf32>
      %c0_27 = arith.constant 0 : index
      %c0_28 = arith.constant 0 : index
      %c0_29 = arith.constant 0 : index
      %88 = vector.load %arg8[%c0_27, %c0_28, %c0_29] : memref<1x8x16xf32, #tpu.memory_space<vmem>>, vector<1x8x16xf32>
      tpu.vector_store %arg8[%c0_27, %c0_28, %c0_29], %87 {strides = array<i32>} : memref<1x8x16xf32, #tpu.memory_space<vmem>>, vector<1x8x16xf32>,
    } else {
    }
    %c0_i32_3 = arith.constant 0 : i32
    %54 = arith.cmpi eq, %arg0, %c0_i32_3 : i32
    %c0_i32_4 = arith.constant 0 : i32
    %55 = arith.cmpi sgt, %arg1, %c0_i32_4 : i32
    %56 = arith.andi %54, %55 : i1
    %57 = arith.extui %56 : i1 to i32
    %c0_i32_5 = arith.constant 0 : i32
    %58 = arith.cmpi ne, %57, %c0_i32_5 : i32
    scf.if %58 {
      %c0_19 = arith.constant 0 : index
      %c0_20 = arith.constant 0 : index
      %c136 = arith.constant 136 : index
      %83 = vector.load %arg5[%c0_19, %c0_20, %c136] : memref<2x8x272xf32, #tpu.memory_space<vmem>>, vector<2x8x8xf32>
      %c0_21 = arith.constant 0 : index
      %c0_22 = arith.constant 0 : index
      %c120 = arith.constant 120 : index
      %84 = vector.load %arg5[%c0_21, %c0_22, %c120] : memref<2x8x272xf32, #tpu.memory_space<vmem>>, vector<2x8x8xf32>
      tpu.vector_store %arg5[%c0_21, %c0_22, %c120], %83 {strides = array<i32>} : memref<2x8x272xf32, #tpu.memory_space<vmem>>, vector<2x8x8xf32>,
    } else {
    }
    %c0_i32_6 = arith.constant 0 : i32
    %59 = arith.cmpi eq, %arg0, %c0_i32_6 : i32
    %60 = arith.extui %59 : i1 to i32
    %c0_i32_7 = arith.constant 0 : i32
    %61 = arith.cmpi ne, %60, %c0_i32_7 : i32
    scf.if %61 {
      %c0_19 = arith.constant 0 : index
      %c0_20 = arith.constant 0 : index
      %83 = vector.load %arg2[%c0_19, %c0_20] : memref<2x16xf32, #tpu.memory_space<vmem>>, vector<2x16xf32>
      %84 = vector.shape_cast %83 : vector<2x16xf32> to vector<2x1x16xf32>
      %85 = vector.shape_cast %84 : vector<2x1x16xf32> to vector<2x1x16xf32>
      %86 = vector.broadcast %85 : vector<2x1x16xf32> to vector<2x8x16xf32>
      %c0_21 = arith.constant 0 : index
      %c0_22 = arith.constant 0 : index
      %c128 = arith.constant 128 : index
      %87 = vector.load %arg5[%c0_21, %c0_22, %c128] : memref<2x8x272xf32, #tpu.memory_space<vmem>>, vector<2x8x16xf32>
      tpu.vector_store %arg5[%c0_21, %c0_22, %c128], %86 {strides = array<i32>} : memref<2x8x272xf32, #tpu.memory_space<vmem>>, vector<2x8x16xf32>,
      %cst = arith.constant 0.000000e+00 : f32
      %88 = vector.broadcast %cst : f32 to vector<2x8x16xf32>
      %89 = vector.broadcast %18 : vector<1x8x1xf32> to vector<2x8x16xf32>
      %90 = arith.addf %88, %89 : vector<2x8x16xf32>
      %c0_23 = arith.constant 0 : index
      %c0_24 = arith.constant 0 : index
      %c120 = arith.constant 120 : index
      %91 = vector.load %arg5[%c0_23, %c0_24, %c120] : memref<2x8x272xf32, #tpu.memory_space<vmem>>, vector<2x8x16xf32>
      %92 = vector.broadcast %2 : vector<1x8x1xf32> to vector<2x8x16xf32>
      %93 = arith.mulf %91, %92 : vector<2x8x16xf32>
      %94 = arith.addf %90, %93 : vector<2x8x16xf32>
      %c0_25 = arith.constant 0 : index
      %c0_26 = arith.constant 0 : index
      %c121 = arith.constant 121 : index
      %95 = vector.load %arg5[%c0_25, %c0_26, %c121] : memref<2x8x272xf32, #tpu.memory_space<vmem>>, vector<2x8x16xf32>
      %96 = vector.broadcast %4 : vector<1x8x1xf32> to vector<2x8x16xf32>
      %97 = arith.mulf %95, %96 : vector<2x8x16xf32>
      %98 = arith.addf %94, %97 : vector<2x8x16xf32>
      %c0_27 = arith.constant 0 : index
      %c0_28 = arith.constant 0 : index
      %c122 = arith.constant 122 : index
      %99 = vector.load %arg5[%c0_27, %c0_28, %c122] : memref<2x8x272xf32, #tpu.memory_space<vmem>>, vector<2x8x16xf32>
      %100 = vector.broadcast %6 : vector<1x8x1xf32> to vector<2x8x16xf32>
      %101 = arith.mulf %99, %100 : vector<2x8x16xf32>
      %102 = arith.addf %98, %101 : vector<2x8x16xf32>
      %c0_29 = arith.constant 0 : index
      %c0_30 = arith.constant 0 : index
      %c123 = arith.constant 123 : index
      %103 = vector.load %arg5[%c0_29, %c0_30, %c123] : memref<2x8x272xf32, #tpu.memory_space<vmem>>, vector<2x8x16xf32>
      %104 = vector.broadcast %8 : vector<1x8x1xf32> to vector<2x8x16xf32>
      %105 = arith.mulf %103, %104 : vector<2x8x16xf32>
      %106 = arith.addf %102, %105 : vector<2x8x16xf32>
      %c0_31 = arith.constant 0 : index
      %c0_32 = arith.constant 0 : index
      %c124 = arith.constant 124 : index
      %107 = vector.load %arg5[%c0_31, %c0_32, %c124] : memref<2x8x272xf32, #tpu.memory_space<vmem>>, vector<2x8x16xf32>
      %108 = vector.broadcast %10 : vector<1x8x1xf32> to vector<2x8x16xf32>
      %109 = arith.mulf %107, %108 : vector<2x8x16xf32>
      %110 = arith.addf %106, %109 : vector<2x8x16xf32>
      %c0_33 = arith.constant 0 : index
      %c0_34 = arith.constant 0 : index
      %c125 = arith.constant 125 : index
      %111 = vector.load %arg5[%c0_33, %c0_34, %c125] : memref<2x8x272xf32, #tpu.memory_space<vmem>>, vector<2x8x16xf32>
      %112 = vector.broadcast %12 : vector<1x8x1xf32> to vector<2x8x16xf32>
      %113 = arith.mulf %111, %112 : vector<2x8x16xf32>
      %114 = arith.addf %110, %113 : vector<2x8x16xf32>
      %c0_35 = arith.constant 0 : index
      %c0_36 = arith.constant 0 : index
      %c126 = arith.constant 126 : index
      %115 = vector.load %arg5[%c0_35, %c0_36, %c126] : memref<2x8x272xf32, #tpu.memory_space<vmem>>, vector<2x8x16xf32>
      %116 = vector.broadcast %14 : vector<1x8x1xf32> to vector<2x8x16xf32>
      %117 = arith.mulf %115, %116 : vector<2x8x16xf32>
      %118 = arith.addf %114, %117 : vector<2x8x16xf32>
      %c0_37 = arith.constant 0 : index
      %c0_38 = arith.constant 0 : index
      %c127 = arith.constant 127 : index
      %119 = vector.load %arg5[%c0_37, %c0_38, %c127] : memref<2x8x272xf32, #tpu.memory_space<vmem>>, vector<2x8x16xf32>
      %120 = vector.broadcast %16 : vector<1x8x1xf32> to vector<2x8x16xf32>
      %121 = arith.mulf %119, %120 : vector<2x8x16xf32>
      %122 = arith.addf %118, %121 : vector<2x8x16xf32>
      %123 = arith.index_cast %arg1 : i32 to index
      %c0_39 = arith.constant 0 : index
      %c0_40 = arith.constant 0 : index
      %c0_41 = arith.constant 0 : index
      %124 = vector.load %arg6[%123, %c0_39, %c0_40, %c0_41] : memref<1x2x8x16xf32, #tpu.memory_space<vmem>>, vector<1x2x8x16xf32>
      %125 = vector.shape_cast %124 : vector<1x2x8x16xf32> to vector<2x8x16xf32>
      %126 = vector.shape_cast %122 : vector<2x8x16xf32> to vector<1x2x8x16xf32>
      tpu.vector_store %arg6[%123, %c0_39, %c0_40, %c0_41], %126 {strides = array<i32>} : memref<1x2x8x16xf32, #tpu.memory_space<vmem>>, vector<1x2x8x16xf32>,
      %c0_42 = arith.constant 0 : index
      %c0_43 = arith.constant 0 : index
      %c0_44 = arith.constant 0 : index
      %127 = vector.load %arg7[%c0_42, %c0_43, %c0_44] : memref<1x8x16xf32, #tpu.memory_space<vmem>>, vector<1x8x16xf32>
      %cst_45 = arith.constant dense<0.000000e+00> : vector<8x16xf32>
      %128 = vector.multi_reduction <add>, %122, %cst_45 [0] : vector<2x8x16xf32> to vector<8x16xf32>
      %129 = vector.shape_cast %128 : vector<8x16xf32> to vector<1x8x16xf32>
      %130 = arith.addf %127, %129 : vector<1x8x16xf32>
      %c0_46 = arith.constant 0 : index
      %c0_47 = arith.constant 0 : index
      %c0_48 = arith.constant 0 : index
      %131 = vector.load %arg7[%c0_46, %c0_47, %c0_48] : memref<1x8x16xf32, #tpu.memory_space<vmem>>, vector<1x8x16xf32>
      tpu.vector_store %arg7[%c0_46, %c0_47, %c0_48], %130 {strides = array<i32>} : memref<1x8x16xf32, #tpu.memory_space<vmem>>, vector<1x8x16xf32>,
      %c0_49 = arith.constant 0 : index
      %c0_50 = arith.constant 0 : index
      %c0_51 = arith.constant 0 : index
      %132 = vector.load %arg8[%c0_49, %c0_50, %c0_51] : memref<1x8x16xf32, #tpu.memory_space<vmem>>, vector<1x8x16xf32>
      %133 = arith.mulf %122, %122 : vector<2x8x16xf32>
      %cst_52 = arith.constant dense<0.000000e+00> : vector<8x16xf32>
      %134 = vector.multi_reduction <add>, %133, %cst_52 [0] : vector<2x8x16xf32> to vector<8x16xf32>
      %135 = vector.shape_cast %134 : vector<8x16xf32> to vector<1x8x16xf32>
      %136 = arith.addf %132, %135 : vector<1x8x16xf32>
      %c0_53 = arith.constant 0 : index
      %c0_54 = arith.constant 0 : index
      %c0_55 = arith.constant 0 : index
      %137 = vector.load %arg8[%c0_53, %c0_54, %c0_55] : memref<1x8x16xf32, #tpu.memory_space<vmem>>, vector<1x8x16xf32>
      tpu.vector_store %arg8[%c0_53, %c0_54, %c0_55], %136 {strides = array<i32>} : memref<1x8x16xf32, #tpu.memory_space<vmem>>, vector<1x8x16xf32>,
    } else {
    }
    %c0_i32_8 = arith.constant 0 : i32
    %62 = arith.cmpi eq, %arg0, %c0_i32_8 : i32
    %c0_i32_9 = arith.constant 0 : i32
    %63 = arith.cmpi eq, %arg1, %c0_i32_9 : i32
    %64 = arith.andi %62, %63 : i1
    %65 = arith.extui %64 : i1 to i32
    %c0_i32_10 = arith.constant 0 : i32
    %66 = arith.cmpi ne, %65, %c0_i32_10 : i32
    scf.if %66 {
      %c0_19 = arith.constant 0 : index
      %c0_20 = arith.constant 0 : index
      %c0_21 = arith.constant 0 : index
      %83 = vector.load %arg7[%c0_19, %c0_20, %c0_21] : memref<1x8x16xf32, #tpu.memory_space<vmem>>, vector<1x8x16xf32>
      %cst = arith.constant dense<0.000000e+00> : vector<1x8xf32>
      %84 = vector.multi_reduction <add>, %83, %cst [2] : vector<1x8x16xf32> to vector<1x8xf32>
      %85 = vector.shape_cast %84 : vector<1x8xf32> to vector<1x8x1xf32>
      %cst_22 = arith.constant dense<0.000000e+00> : vector<8x1xf32>
      %86 = vector.multi_reduction <add>, %85, %cst_22 [0] : vector<1x8x1xf32> to vector<8x1xf32>
      %87 = vector.shape_cast %86 : vector<8x1xf32> to vector<1x8x1xf32>
      %c0_23 = arith.constant 0 : index
      %c0_24 = arith.constant 0 : index
      %c0_25 = arith.constant 0 : index
      %88 = vector.load %arg8[%c0_23, %c0_24, %c0_25] : memref<1x8x16xf32, #tpu.memory_space<vmem>>, vector<1x8x16xf32>
      %cst_26 = arith.constant dense<0.000000e+00> : vector<1x8xf32>
      %89 = vector.multi_reduction <add>, %88, %cst_26 [2] : vector<1x8x16xf32> to vector<1x8xf32>
      %90 = vector.shape_cast %89 : vector<1x8xf32> to vector<1x8x1xf32>
      %cst_27 = arith.constant dense<0.000000e+00> : vector<8x1xf32>
      %91 = vector.multi_reduction <add>, %90, %cst_27 [0] : vector<1x8x1xf32> to vector<8x1xf32>
      %92 = vector.shape_cast %91 : vector<8x1xf32> to vector<1x8x1xf32>
      %cst_28 = arith.constant 0.000000e+00 : f32
      %93 = vector.broadcast %cst_28 : f32 to vector<2x8x9xf32>
      %94 = vector.broadcast %18 : vector<1x8x1xf32> to vector<2x8x9xf32>
      %95 = arith.addf %93, %94 : vector<2x8x9xf32>
      %c0_29 = arith.constant 0 : index
      %c0_30 = arith.constant 0 : index
      %c136 = arith.constant 136 : index
      %96 = vector.load %arg5[%c0_29, %c0_30, %c136] : memref<2x8x272xf32, #tpu.memory_space<vmem>>, vector<2x8x9xf32>
      %97 = vector.broadcast %2 : vector<1x8x1xf32> to vector<2x8x9xf32>
      %98 = arith.mulf %96, %97 : vector<2x8x9xf32>
      %99 = arith.addf %95, %98 : vector<2x8x9xf32>
      %c0_31 = arith.constant 0 : index
      %c0_32 = arith.constant 0 : index
      %c137 = arith.constant 137 : index
      %100 = vector.load %arg5[%c0_31, %c0_32, %c137] : memref<2x8x272xf32, #tpu.memory_space<vmem>>, vector<2x8x9xf32>
      %101 = vector.broadcast %4 : vector<1x8x1xf32> to vector<2x8x9xf32>
      %102 = arith.mulf %100, %101 : vector<2x8x9xf32>
      %103 = arith.addf %99, %102 : vector<2x8x9xf32>
      %c0_33 = arith.constant 0 : index
      %c0_34 = arith.constant 0 : index
      %c138 = arith.constant 138 : index
      %104 = vector.load %arg5[%c0_33, %c0_34, %c138] : memref<2x8x272xf32, #tpu.memory_space<vmem>>, vector<2x8x9xf32>
      %105 = vector.broadcast %6 : vector<1x8x1xf32> to vector<2x8x9xf32>
      %106 = arith.mulf %104, %105 : vector<2x8x9xf32>
      %107 = arith.addf %103, %106 : vector<2x8x9xf32>
      %c0_35 = arith.constant 0 : index
      %c0_36 = arith.constant 0 : index
      %c139 = arith.constant 139 : index
      %108 = vector.load %arg5[%c0_35, %c0_36, %c139] : memref<2x8x272xf32, #tpu.memory_space<vmem>>, vector<2x8x9xf32>
      %109 = vector.broadcast %8 : vector<1x8x1xf32> to vector<2x8x9xf32>
      %110 = arith.mulf %108, %109 : vector<2x8x9xf32>
      %111 = arith.addf %107, %110 : vector<2x8x9xf32>
      %c0_37 = arith.constant 0 : index
      %c0_38 = arith.constant 0 : index
      %c140 = arith.constant 140 : index
      %112 = vector.load %arg5[%c0_37, %c0_38, %c140] : memref<2x8x272xf32, #tpu.memory_space<vmem>>, vector<2x8x9xf32>
      %113 = vector.broadcast %10 : vector<1x8x1xf32> to vector<2x8x9xf32>
      %114 = arith.mulf %112, %113 : vector<2x8x9xf32>
      %115 = arith.addf %111, %114 : vector<2x8x9xf32>
      %c0_39 = arith.constant 0 : index
      %c0_40 = arith.constant 0 : index
      %c141 = arith.constant 141 : index
      %116 = vector.load %arg5[%c0_39, %c0_40, %c141] : memref<2x8x272xf32, #tpu.memory_space<vmem>>, vector<2x8x9xf32>
      %117 = vector.broadcast %12 : vector<1x8x1xf32> to vector<2x8x9xf32>
      %118 = arith.mulf %116, %117 : vector<2x8x9xf32>
      %119 = arith.addf %115, %118 : vector<2x8x9xf32>
      %c0_41 = arith.constant 0 : index
      %c0_42 = arith.constant 0 : index
      %c142 = arith.constant 142 : index
      %120 = vector.load %arg5[%c0_41, %c0_42, %c142] : memref<2x8x272xf32, #tpu.memory_space<vmem>>, vector<2x8x9xf32>
      %121 = vector.broadcast %14 : vector<1x8x1xf32> to vector<2x8x9xf32>
      %122 = arith.mulf %120, %121 : vector<2x8x9xf32>
      %123 = arith.addf %119, %122 : vector<2x8x9xf32>
      %c0_43 = arith.constant 0 : index
      %c0_44 = arith.constant 0 : index
      %c143 = arith.constant 143 : index
      %124 = vector.load %arg5[%c0_43, %c0_44, %c143] : memref<2x8x272xf32, #tpu.memory_space<vmem>>, vector<2x8x9xf32>
      %125 = vector.broadcast %16 : vector<1x8x1xf32> to vector<2x8x9xf32>
      %126 = arith.mulf %124, %125 : vector<2x8x9xf32>
      %127 = arith.addf %123, %126 : vector<2x8x9xf32>
      %cst_45 = arith.constant dense<0.000000e+00> : vector<2x8xf32>
      %128 = vector.multi_reduction <add>, %127, %cst_45 [2] : vector<2x8x9xf32> to vector<2x8xf32>
      %129 = vector.shape_cast %128 : vector<2x8xf32> to vector<2x8x1xf32>
      %cst_46 = arith.constant dense<0.000000e+00> : vector<8x1xf32>
      %130 = vector.multi_reduction <add>, %129, %cst_46 [0] : vector<2x8x1xf32> to vector<8x1xf32>
      %131 = vector.shape_cast %130 : vector<8x1xf32> to vector<1x8x1xf32>
      %132 = arith.addf %87, %131 : vector<1x8x1xf32>
      %133 = arith.mulf %127, %127 : vector<2x8x9xf32>
      %cst_47 = arith.constant dense<0.000000e+00> : vector<2x8xf32>
      %134 = vector.multi_reduction <add>, %133, %cst_47 [2] : vector<2x8x9xf32> to vector<2x8xf32>
      %135 = vector.shape_cast %134 : vector<2x8xf32> to vector<2x8x1xf32>
      %cst_48 = arith.constant dense<0.000000e+00> : vector<8x1xf32>
      %136 = vector.multi_reduction <add>, %135, %cst_48 [0] : vector<2x8x1xf32> to vector<8x1xf32>
      %137 = vector.shape_cast %136 : vector<8x1xf32> to vector<1x8x1xf32>
      %138 = arith.addf %92, %137 : vector<1x8x1xf32>
      %cst_49 = arith.constant 2.000000e-02 : f32
      %139 = vector.broadcast %cst_49 : f32 to vector<1x8x1xf32>
      %140 = arith.mulf %132, %139 : vector<1x8x1xf32>
      %cst_50 = arith.constant 2.000000e-02 : f32
      %141 = vector.broadcast %cst_50 : f32 to vector<1x8x1xf32>
      %142 = arith.mulf %138, %141 : vector<1x8x1xf32>
      %143 = arith.mulf %140, %140 : vector<1x8x1xf32>
      %144 = arith.subf %142, %143 : vector<1x8x1xf32>
      %cst_51 = arith.constant 9.99999974E-6 : f32
      %145 = vector.broadcast %cst_51 : f32 to vector<1x8x1xf32>
      %146 = arith.addf %144, %145 : vector<1x8x1xf32>
      %147 = math.rsqrt %146 : vector<1x8x1xf32>
      %148 = arith.mulf %147, %20 : vector<1x8x1xf32>
      %c0_52 = arith.constant 0 : index
      %c0_53 = arith.constant 0 : index
      %c0_54 = arith.constant 0 : index
      %149 = vector.load %arg9[%c0_52, %c0_53, %c0_54] : memref<4x8x1xf32, #tpu.memory_space<vmem>>, vector<1x8x1xf32>
      tpu.vector_store %arg9[%c0_52, %c0_53, %c0_54], %148 {strides = array<i32>} : memref<4x8x1xf32, #tpu.memory_space<vmem>>, vector<1x8x1xf32>,
      %150 = arith.mulf %140, %148 : vector<1x8x1xf32>
      %151 = arith.subf %22, %150 : vector<1x8x1xf32>
      %c1 = arith.constant 1 : index
      %c0_55 = arith.constant 0 : index
      %c0_56 = arith.constant 0 : index
      %152 = vector.load %arg9[%c1, %c0_55, %c0_56] : memref<4x8x1xf32, #tpu.memory_space<vmem>>, vector<1x8x1xf32>
      tpu.vector_store %arg9[%c1, %c0_55, %c0_56], %151 {strides = array<i32>} : memref<4x8x1xf32, #tpu.memory_space<vmem>>, vector<1x8x1xf32>,
    } else {
    }
    %c1_i32 = arith.constant 1 : i32
    %67 = arith.cmpi eq, %arg0, %c1_i32 : i32
    %c0_i32_11 = arith.constant 0 : i32
    %68 = arith.cmpi eq, %arg1, %c0_i32_11 : i32
    %69 = arith.andi %67, %68 : i1
    %70 = arith.extui %69 : i1 to i32
    %c0_i32_12 = arith.constant 0 : i32
    %71 = arith.cmpi ne, %70, %c0_i32_12 : i32
    scf.if %71 {
      %cst = arith.constant 0.000000e+00 : f32
      %83 = vector.broadcast %cst : f32 to vector<1x8x16xf32>
      %c0_19 = arith.constant 0 : index
      %c0_20 = arith.constant 0 : index
      %c0_21 = arith.constant 0 : index
      %84 = vector.load %arg7[%c0_19, %c0_20, %c0_21] : memref<1x8x16xf32, #tpu.memory_space<vmem>>, vector<1x8x16xf32>
      tpu.vector_store %arg7[%c0_19, %c0_20, %c0_21], %83 {strides = array<i32>} : memref<1x8x16xf32, #tpu.memory_space<vmem>>, vector<1x8x16xf32>,
      %cst_22 = arith.constant 0.000000e+00 : f32
      %85 = vector.broadcast %cst_22 : f32 to vector<1x8x16xf32>
      %c0_23 = arith.constant 0 : index
      %c0_24 = arith.constant 0 : index
      %c0_25 = arith.constant 0 : index
      %86 = vector.load %arg8[%c0_23, %c0_24, %c0_25] : memref<1x8x16xf32, #tpu.memory_space<vmem>>, vector<1x8x16xf32>
      tpu.vector_store %arg8[%c0_23, %c0_24, %c0_25], %85 {strides = array<i32>} : memref<1x8x16xf32, #tpu.memory_space<vmem>>, vector<1x8x16xf32>,
    } else {
    }
    %c1_i32_13 = arith.constant 1 : i32
    %72 = arith.cmpi eq, %arg0, %c1_i32_13 : i32
    %73 = arith.extui %72 : i1 to i32
    %c0_i32_14 = arith.constant 0 : i32
    %74 = arith.cmpi ne, %73, %c0_i32_14 : i32
    scf.if %74 {
      %83 = arith.index_cast %arg1 : i32 to index
      %c0_19 = arith.constant 0 : index
      %c0_20 = arith.constant 0 : index
      %c0_21 = arith.constant 0 : index
      %84 = vector.load %arg6[%83, %c0_19, %c0_20, %c0_21] : memref<1x2x8x16xf32, #tpu.memory_space<vmem>>, vector<1x2x8x16xf32>
      %85 = vector.shape_cast %84 : vector<1x2x8x16xf32> to vector<2x8x16xf32>
      %c0_22 = arith.constant 0 : index
      %c0_23 = arith.constant 0 : index
      %c0_24 = arith.constant 0 : index
      %86 = vector.load %arg9[%c0_22, %c0_23, %c0_24] : memref<4x8x1xf32, #tpu.memory_space<vmem>>, vector<1x8x1xf32>
      %87 = vector.broadcast %86 : vector<1x8x1xf32> to vector<2x8x16xf32>
      %88 = arith.mulf %85, %87 : vector<2x8x16xf32>
      %c1 = arith.constant 1 : index
      %c0_25 = arith.constant 0 : index
      %c0_26 = arith.constant 0 : index
      %89 = vector.load %arg9[%c1, %c0_25, %c0_26] : memref<4x8x1xf32, #tpu.memory_space<vmem>>, vector<1x8x1xf32>
      %90 = vector.broadcast %89 : vector<1x8x1xf32> to vector<2x8x16xf32>
      %91 = arith.addf %88, %90 : vector<2x8x16xf32>
      %cst = arith.constant 0.000000e+00 : f32
      %92 = vector.broadcast %cst : f32 to vector<2x8x16xf32>
      %93 = arith.maximumf %91, %92 : vector<2x8x16xf32>
      %94 = arith.index_cast %arg1 : i32 to index
      %c0_27 = arith.constant 0 : index
      %c0_28 = arith.constant 0 : index
      %c0_29 = arith.constant 0 : index
      %95 = vector.load %arg6[%94, %c0_27, %c0_28, %c0_29] : memref<1x2x8x16xf32, #tpu.memory_space<vmem>>, vector<1x2x8x16xf32>
      %96 = vector.shape_cast %95 : vector<1x2x8x16xf32> to vector<2x8x16xf32>
      %97 = vector.shape_cast %93 : vector<2x8x16xf32> to vector<1x2x8x16xf32>
      tpu.vector_store %arg6[%94, %c0_27, %c0_28, %c0_29], %97 {strides = array<i32>} : memref<1x2x8x16xf32, #tpu.memory_space<vmem>>, vector<1x2x8x16xf32>,
      %cst_30 = arith.constant 0.000000e+00 : f32
      %98 = vector.broadcast %cst_30 : f32 to vector<2x8x16xf32>
      %99 = vector.broadcast %40 : vector<1x8x1xf32> to vector<2x8x16xf32>
      %100 = arith.addf %98, %99 : vector<2x8x16xf32>
      %101 = vector.extract_strided_slice %93 {offsets = [0, 0, 0], sizes = [2, 1, 16], strides = [1, 1, 1]} : vector<2x8x16xf32> to vector<2x1x16xf32>
      %102 = vector.broadcast %101 : vector<2x1x16xf32> to vector<2x8x16xf32>
      %103 = vector.broadcast %24 : vector<1x8x1xf32> to vector<2x8x16xf32>
      %104 = arith.mulf %102, %103 : vector<2x8x16xf32>
      %105 = arith.addf %100, %104 : vector<2x8x16xf32>
      %106 = vector.extract_strided_slice %93 {offsets = [0, 1, 0], sizes = [2, 1, 16], strides = [1, 1, 1]} : vector<2x8x16xf32> to vector<2x1x16xf32>
      %107 = vector.broadcast %106 : vector<2x1x16xf32> to vector<2x8x16xf32>
      %108 = vector.broadcast %26 : vector<1x8x1xf32> to vector<2x8x16xf32>
      %109 = arith.mulf %107, %108 : vector<2x8x16xf32>
      %110 = arith.addf %105, %109 : vector<2x8x16xf32>
      %111 = vector.extract_strided_slice %93 {offsets = [0, 2, 0], sizes = [2, 1, 16], strides = [1, 1, 1]} : vector<2x8x16xf32> to vector<2x1x16xf32>
      %112 = vector.broadcast %111 : vector<2x1x16xf32> to vector<2x8x16xf32>
      %113 = vector.broadcast %28 : vector<1x8x1xf32> to vector<2x8x16xf32>
      %114 = arith.mulf %112, %113 : vector<2x8x16xf32>
      %115 = arith.addf %110, %114 : vector<2x8x16xf32>
      %116 = vector.extract_strided_slice %93 {offsets = [0, 3, 0], sizes = [2, 1, 16], strides = [1, 1, 1]} : vector<2x8x16xf32> to vector<2x1x16xf32>
      %117 = vector.broadcast %116 : vector<2x1x16xf32> to vector<2x8x16xf32>
      %118 = vector.broadcast %30 : vector<1x8x1xf32> to vector<2x8x16xf32>
      %119 = arith.mulf %117, %118 : vector<2x8x16xf32>
      %120 = arith.addf %115, %119 : vector<2x8x16xf32>
      %121 = vector.extract_strided_slice %93 {offsets = [0, 4, 0], sizes = [2, 1, 16], strides = [1, 1, 1]} : vector<2x8x16xf32> to vector<2x1x16xf32>
      %122 = vector.broadcast %121 : vector<2x1x16xf32> to vector<2x8x16xf32>
      %123 = vector.broadcast %32 : vector<1x8x1xf32> to vector<2x8x16xf32>
      %124 = arith.mulf %122, %123 : vector<2x8x16xf32>
      %125 = arith.addf %120, %124 : vector<2x8x16xf32>
      %126 = vector.extract_strided_slice %93 {offsets = [0, 5, 0], sizes = [2, 1, 16], strides = [1, 1, 1]} : vector<2x8x16xf32> to vector<2x1x16xf32>
      %127 = vector.broadcast %126 : vector<2x1x16xf32> to vector<2x8x16xf32>
      %128 = vector.broadcast %34 : vector<1x8x1xf32> to vector<2x8x16xf32>
      %129 = arith.mulf %127, %128 : vector<2x8x16xf32>
      %130 = arith.addf %125, %129 : vector<2x8x16xf32>
      %131 = vector.extract_strided_slice %93 {offsets = [0, 6, 0], sizes = [2, 1, 16], strides = [1, 1, 1]} : vector<2x8x16xf32> to vector<2x1x16xf32>
      %132 = vector.broadcast %131 : vector<2x1x16xf32> to vector<2x8x16xf32>
      %133 = vector.broadcast %36 : vector<1x8x1xf32> to vector<2x8x16xf32>
      %134 = arith.mulf %132, %133 : vector<2x8x16xf32>
      %135 = arith.addf %130, %134 : vector<2x8x16xf32>
      %136 = vector.extract_strided_slice %93 {offsets = [0, 7, 0], sizes = [2, 1, 16], strides = [1, 1, 1]} : vector<2x8x16xf32> to vector<2x1x16xf32>
      %137 = vector.broadcast %136 : vector<2x1x16xf32> to vector<2x8x16xf32>
      %138 = vector.broadcast %38 : vector<1x8x1xf32> to vector<2x8x16xf32>
      %139 = arith.mulf %137, %138 : vector<2x8x16xf32>
      %140 = arith.addf %135, %139 : vector<2x8x16xf32>
      %c0_31 = arith.constant 0 : index
      %c0_32 = arith.constant 0 : index
      %c0_33 = arith.constant 0 : index
      %141 = vector.load %arg7[%c0_31, %c0_32, %c0_33] : memref<1x8x16xf32, #tpu.memory_space<vmem>>, vector<1x8x16xf32>
      %cst_34 = arith.constant dense<0.000000e+00> : vector<8x16xf32>
      %142 = vector.multi_reduction <add>, %140, %cst_34 [0] : vector<2x8x16xf32> to vector<8x16xf32>
      %143 = vector.shape_cast %142 : vector<8x16xf32> to vector<1x8x16xf32>
      %144 = arith.addf %141, %143 : vector<1x8x16xf32>
      %c0_35 = arith.constant 0 : index
      %c0_36 = arith.constant 0 : index
      %c0_37 = arith.constant 0 : index
      %145 = vector.load %arg7[%c0_35, %c0_36, %c0_37] : memref<1x8x16xf32, #tpu.memory_space<vmem>>, vector<1x8x16xf32>
      tpu.vector_store %arg7[%c0_35, %c0_36, %c0_37], %144 {strides = array<i32>} : memref<1x8x16xf32, #tpu.memory_space<vmem>>, vector<1x8x16xf32>,
      %c0_38 = arith.constant 0 : index
      %c0_39 = arith.constant 0 : index
      %c0_40 = arith.constant 0 : index
      %146 = vector.load %arg8[%c0_38, %c0_39, %c0_40] : memref<1x8x16xf32, #tpu.memory_space<vmem>>, vector<1x8x16xf32>
      %147 = arith.mulf %140, %140 : vector<2x8x16xf32>
      %cst_41 = arith.constant dense<0.000000e+00> : vector<8x16xf32>
      %148 = vector.multi_reduction <add>, %147, %cst_41 [0] : vector<2x8x16xf32> to vector<8x16xf32>
      %149 = vector.shape_cast %148 : vector<8x16xf32> to vector<1x8x16xf32>
      %150 = arith.addf %146, %149 : vector<1x8x16xf32>
      %c0_42 = arith.constant 0 : index
      %c0_43 = arith.constant 0 : index
      %c0_44 = arith.constant 0 : index
      %151 = vector.load %arg8[%c0_42, %c0_43, %c0_44] : memref<1x8x16xf32, #tpu.memory_space<vmem>>, vector<1x8x16xf32>
      tpu.vector_store %arg8[%c0_42, %c0_43, %c0_44], %150 {strides = array<i32>} : memref<1x8x16xf32, #tpu.memory_space<vmem>>, vector<1x8x16xf32>,
    } else {
    }
    %c1_i32_15 = arith.constant 1 : i32
    %75 = arith.cmpi eq, %arg0, %c1_i32_15 : i32
    %c0_i32_16 = arith.constant 0 : i32
    %76 = arith.cmpi eq, %arg1, %c0_i32_16 : i32
    %77 = arith.andi %75, %76 : i1
    %78 = arith.extui %77 : i1 to i32
    %c0_i32_17 = arith.constant 0 : i32
    %79 = arith.cmpi ne, %78, %c0_i32_17 : i32
    scf.if %79 {
      %c0_19 = arith.constant 0 : index
      %c0_20 = arith.constant 0 : index
      %c0_21 = arith.constant 0 : index
      %83 = vector.load %arg7[%c0_19, %c0_20, %c0_21] : memref<1x8x16xf32, #tpu.memory_space<vmem>>, vector<1x8x16xf32>
      %cst = arith.constant dense<0.000000e+00> : vector<1x8xf32>
      %84 = vector.multi_reduction <add>, %83, %cst [2] : vector<1x8x16xf32> to vector<1x8xf32>
      %85 = vector.shape_cast %84 : vector<1x8xf32> to vector<1x8x1xf32>
      %cst_22 = arith.constant dense<0.000000e+00> : vector<8x1xf32>
      %86 = vector.multi_reduction <add>, %85, %cst_22 [0] : vector<1x8x1xf32> to vector<8x1xf32>
      %87 = vector.shape_cast %86 : vector<8x1xf32> to vector<1x8x1xf32>
      %c0_23 = arith.constant 0 : index
      %c0_24 = arith.constant 0 : index
      %c0_25 = arith.constant 0 : index
      %88 = vector.load %arg8[%c0_23, %c0_24, %c0_25] : memref<1x8x16xf32, #tpu.memory_space<vmem>>, vector<1x8x16xf32>
      %cst_26 = arith.constant dense<0.000000e+00> : vector<1x8xf32>
      %89 = vector.multi_reduction <add>, %88, %cst_26 [2] : vector<1x8x16xf32> to vector<1x8xf32>
      %90 = vector.shape_cast %89 : vector<1x8xf32> to vector<1x8x1xf32>
      %cst_27 = arith.constant dense<0.000000e+00> : vector<8x1xf32>
      %91 = vector.multi_reduction <add>, %90, %cst_27 [0] : vector<1x8x1xf32> to vector<8x1xf32>
      %92 = vector.shape_cast %91 : vector<8x1xf32> to vector<1x8x1xf32>
      %cst_28 = arith.constant 3.125000e-02 : f32
      %93 = vector.broadcast %cst_28 : f32 to vector<1x8x1xf32>
      %94 = arith.mulf %87, %93 : vector<1x8x1xf32>
      %cst_29 = arith.constant 3.125000e-02 : f32
      %95 = vector.broadcast %cst_29 : f32 to vector<1x8x1xf32>
      %96 = arith.mulf %92, %95 : vector<1x8x1xf32>
      %97 = arith.mulf %94, %94 : vector<1x8x1xf32>
      %98 = arith.subf %96, %97 : vector<1x8x1xf32>
      %cst_30 = arith.constant 9.99999974E-6 : f32
      %99 = vector.broadcast %cst_30 : f32 to vector<1x8x1xf32>
      %100 = arith.addf %98, %99 : vector<1x8x1xf32>
      %101 = math.rsqrt %100 : vector<1x8x1xf32>
      %102 = arith.mulf %101, %42 : vector<1x8x1xf32>
      %c2 = arith.constant 2 : index
      %c0_31 = arith.constant 0 : index
      %c0_32 = arith.constant 0 : index
      %103 = vector.load %arg9[%c2, %c0_31, %c0_32] : memref<4x8x1xf32, #tpu.memory_space<vmem>>, vector<1x8x1xf32>
      tpu.vector_store %arg9[%c2, %c0_31, %c0_32], %102 {strides = array<i32>} : memref<4x8x1xf32, #tpu.memory_space<vmem>>, vector<1x8x1xf32>,
      %104 = arith.mulf %94, %102 : vector<1x8x1xf32>
      %105 = arith.subf %44, %104 : vector<1x8x1xf32>
      %c3 = arith.constant 3 : index
      %c0_33 = arith.constant 0 : index
      %c0_34 = arith.constant 0 : index
      %106 = vector.load %arg9[%c3, %c0_33, %c0_34] : memref<4x8x1xf32, #tpu.memory_space<vmem>>, vector<1x8x1xf32>
      tpu.vector_store %arg9[%c3, %c0_33, %c0_34], %105 {strides = array<i32>} : memref<4x8x1xf32, #tpu.memory_space<vmem>>, vector<1x8x1xf32>,
    } else {
    }
    %c2_i32 = arith.constant 2 : i32
    %80 = arith.cmpi eq, %arg0, %c2_i32 : i32
    %81 = arith.extui %80 : i1 to i32
    %c0_i32_18 = arith.constant 0 : i32
    %82 = arith.cmpi ne, %81, %c0_i32_18 : i32
    scf.if %82 {
      %83 = arith.index_cast %arg1 : i32 to index
      %c0_19 = arith.constant 0 : index
      %c0_20 = arith.constant 0 : index
      %c0_21 = arith.constant 0 : index
      %84 = vector.load %arg6[%83, %c0_19, %c0_20, %c0_21] : memref<1x2x8x16xf32, #tpu.memory_space<vmem>>, vector<1x2x8x16xf32>
      %85 = vector.shape_cast %84 : vector<1x2x8x16xf32> to vector<2x8x16xf32>
      %cst = arith.constant 0.000000e+00 : f32
      %86 = vector.broadcast %cst : f32 to vector<2x8x16xf32>
      %87 = vector.broadcast %40 : vector<1x8x1xf32> to vector<2x8x16xf32>
      %88 = arith.addf %86, %87 : vector<2x8x16xf32>
      %89 = vector.extract_strided_slice %85 {offsets = [0, 0, 0], sizes = [2, 1, 16], strides = [1, 1, 1]} : vector<2x8x16xf32> to vector<2x1x16xf32>
      %90 = vector.broadcast %89 : vector<2x1x16xf32> to vector<2x8x16xf32>
      %91 = vector.broadcast %24 : vector<1x8x1xf32> to vector<2x8x16xf32>
      %92 = arith.mulf %90, %91 : vector<2x8x16xf32>
      %93 = arith.addf %88, %92 : vector<2x8x16xf32>
      %94 = vector.extract_strided_slice %85 {offsets = [0, 1, 0], sizes = [2, 1, 16], strides = [1, 1, 1]} : vector<2x8x16xf32> to vector<2x1x16xf32>
      %95 = vector.broadcast %94 : vector<2x1x16xf32> to vector<2x8x16xf32>
      %96 = vector.broadcast %26 : vector<1x8x1xf32> to vector<2x8x16xf32>
      %97 = arith.mulf %95, %96 : vector<2x8x16xf32>
      %98 = arith.addf %93, %97 : vector<2x8x16xf32>
      %99 = vector.extract_strided_slice %85 {offsets = [0, 2, 0], sizes = [2, 1, 16], strides = [1, 1, 1]} : vector<2x8x16xf32> to vector<2x1x16xf32>
      %100 = vector.broadcast %99 : vector<2x1x16xf32> to vector<2x8x16xf32>
      %101 = vector.broadcast %28 : vector<1x8x1xf32> to vector<2x8x16xf32>
      %102 = arith.mulf %100, %101 : vector<2x8x16xf32>
      %103 = arith.addf %98, %102 : vector<2x8x16xf32>
      %104 = vector.extract_strided_slice %85 {offsets = [0, 3, 0], sizes = [2, 1, 16], strides = [1, 1, 1]} : vector<2x8x16xf32> to vector<2x1x16xf32>
      %105 = vector.broadcast %104 : vector<2x1x16xf32> to vector<2x8x16xf32>
      %106 = vector.broadcast %30 : vector<1x8x1xf32> to vector<2x8x16xf32>
      %107 = arith.mulf %105, %106 : vector<2x8x16xf32>
      %108 = arith.addf %103, %107 : vector<2x8x16xf32>
      %109 = vector.extract_strided_slice %85 {offsets = [0, 4, 0], sizes = [2, 1, 16], strides = [1, 1, 1]} : vector<2x8x16xf32> to vector<2x1x16xf32>
      %110 = vector.broadcast %109 : vector<2x1x16xf32> to vector<2x8x16xf32>
      %111 = vector.broadcast %32 : vector<1x8x1xf32> to vector<2x8x16xf32>
      %112 = arith.mulf %110, %111 : vector<2x8x16xf32>
      %113 = arith.addf %108, %112 : vector<2x8x16xf32>
      %114 = vector.extract_strided_slice %85 {offsets = [0, 5, 0], sizes = [2, 1, 16], strides = [1, 1, 1]} : vector<2x8x16xf32> to vector<2x1x16xf32>
      %115 = vector.broadcast %114 : vector<2x1x16xf32> to vector<2x8x16xf32>
      %116 = vector.broadcast %34 : vector<1x8x1xf32> to vector<2x8x16xf32>
      %117 = arith.mulf %115, %116 : vector<2x8x16xf32>
      %118 = arith.addf %113, %117 : vector<2x8x16xf32>
      %119 = vector.extract_strided_slice %85 {offsets = [0, 6, 0], sizes = [2, 1, 16], strides = [1, 1, 1]} : vector<2x8x16xf32> to vector<2x1x16xf32>
      %120 = vector.broadcast %119 : vector<2x1x16xf32> to vector<2x8x16xf32>
      %121 = vector.broadcast %36 : vector<1x8x1xf32> to vector<2x8x16xf32>
      %122 = arith.mulf %120, %121 : vector<2x8x16xf32>
      %123 = arith.addf %118, %122 : vector<2x8x16xf32>
      %124 = vector.extract_strided_slice %85 {offsets = [0, 7, 0], sizes = [2, 1, 16], strides = [1, 1, 1]} : vector<2x8x16xf32> to vector<2x1x16xf32>
      %125 = vector.broadcast %124 : vector<2x1x16xf32> to vector<2x8x16xf32>
      %126 = vector.broadcast %38 : vector<1x8x1xf32> to vector<2x8x16xf32>
      %127 = arith.mulf %125, %126 : vector<2x8x16xf32>
      %128 = arith.addf %123, %127 : vector<2x8x16xf32>
      %c2 = arith.constant 2 : index
      %c0_22 = arith.constant 0 : index
      %c0_23 = arith.constant 0 : index
      %129 = vector.load %arg9[%c2, %c0_22, %c0_23] : memref<4x8x1xf32, #tpu.memory_space<vmem>>, vector<1x8x1xf32>
      %130 = vector.broadcast %129 : vector<1x8x1xf32> to vector<2x8x16xf32>
      %131 = arith.mulf %128, %130 : vector<2x8x16xf32>
      %c3 = arith.constant 3 : index
      %c0_24 = arith.constant 0 : index
      %c0_25 = arith.constant 0 : index
      %132 = vector.load %arg9[%c3, %c0_24, %c0_25] : memref<4x8x1xf32, #tpu.memory_space<vmem>>, vector<1x8x1xf32>
      %133 = vector.broadcast %132 : vector<1x8x1xf32> to vector<2x8x16xf32>
      %134 = arith.addf %131, %133 : vector<2x8x16xf32>
      %135 = arith.addf %134, %85 : vector<2x8x16xf32>
      %cst_26 = arith.constant 0.000000e+00 : f32
      %136 = vector.broadcast %cst_26 : f32 to vector<2x8x16xf32>
      %137 = arith.maximumf %135, %136 : vector<2x8x16xf32>
      %138 = vector.broadcast %46 : vector<1x8x1xf32> to vector<2x8x16xf32>
      %139 = arith.mulf %137, %138 : vector<2x8x16xf32>
      %140 = vector.broadcast %48 : vector<1x8x1xf32> to vector<2x8x16xf32>
      %141 = arith.addf %139, %140 : vector<2x8x16xf32>
      %cst_27 = arith.constant dense<0.000000e+00> : vector<2x16xf32>
      %142 = vector.multi_reduction <add>, %141, %cst_27 [1] : vector<2x8x16xf32> to vector<2x16xf32>
      %c0_28 = arith.constant 0 : index
      %c0_29 = arith.constant 0 : index
      %143 = vector.load %arg4[%c0_28, %c0_29] : memref<2x16xf32, #tpu.memory_space<vmem>>, vector<2x16xf32>
      tpu.vector_store %arg4[%c0_28, %c0_29], %142 {strides = array<i32>} : memref<2x16xf32, #tpu.memory_space<vmem>>, vector<2x16xf32>,
    } else {
    }
    return
  }
  func.func @transform_0(%arg0: i32, %arg1: i32) -> (i32, i32) {
    %c0_i32 = arith.constant 0 : i32
    %0 = arith.cmpi eq, %arg0, %c0_i32 : i32
    %c0_i32_0 = arith.constant 0 : i32
    %1 = arith.select %0, %arg1, %c0_i32_0 : i32
    %c0_i32_1 = arith.constant 0 : i32
    %c0_i32_2 = arith.constant 0 : i32
    return %c0_i32_1, %1 : i32, i32
  }
  func.func @transform_1(%arg0: i32, %arg1: i32) -> (i32, i32) {
    %c0_i32 = arith.constant 0 : i32
    %c0_i32_0 = arith.constant 0 : i32
    %c0_i32_1 = arith.constant 0 : i32
    return %c0_i32, %c0_i32_0 : i32, i32
  }
  func.func @transform_2(%arg0: i32, %arg1: i32) -> (i32, i32) {
    %c2_i32 = arith.constant 2 : i32
    %0 = arith.cmpi eq, %arg0, %c2_i32 : i32
    %c0_i32 = arith.constant 0 : i32
    %1 = arith.select %0, %arg1, %c0_i32 : i32
    %c0_i32_0 = arith.constant 0 : i32
    %c0_i32_1 = arith.constant 0 : i32
    return %c0_i32_0, %1 : i32, i32
  }
}

</mosaic_0001>

<bundles_post_ra>
// kernel: tpu_custom_call.1
= control target key start
LH: loop header
LB: loop body
LE: loop exit
PB: predicated region body
PF: predicated region fallthrough
CT: control target
= control target key end

     0   :  { %7 = vsyncpa [#allocation8], 0  ;;  %s1949_s0 = inlined_call_operand.hbm [shape: f32[2,16], index: 0, kind: input, shape index: {}]   ;;  %s1950_s1 = inlined_call_operand.hbm [shape: f32[8,24], index: 1, kind: input, shape index: {}]   ;;  %s1951_s2 = inlined_call_operand.hbm [shape: f32[2,16], index: 2, kind: output, shape index: {}]  }
   0x1   :  { %9 = vsyncpa [#allocation8 + $0x1], 0 }
   0x2   :  { %10 = vsyncpa [#allocation11], 0 }
   0x3   :  { %11 = vsyncpa [#allocation9], 0 }
   0x4   :  { %13 = vsyncpa [#allocation9 + $0x1], 0  ;;  %s1691_s9 = smov 0   ;;  %s1693_s10 = smov 0  }
   0x5   :  { %s1695_s11 = smov 0  }
   0x6 LB: > { %s1304_s12 = sadd.s32 4294967295, %s1606_s11   ;;  %s1305_s13 = sadd.s32 4294967294, %s1606_s11   ;;  %s1606_s11 = sphi %s1695_s11, %s19_s11   ;;  %s1602_s10 = sphi %s1693_s10, %s1960_s10   ;;  %s1598_s9 = sphi %s1691_s9, %s1959_s9  }
   0x7   : > { %s31_s14 = sadd.s32 1, %s1602_s10  ;;  %p1306_p0 = scmp.ge.s32.totalorder %s1606_s11, 1 }
   0x8   : > { %p33_p1 = scmp.ge.s32.totalorder %s31_s14, 3  ;;  %p117_p2 = scmp.lt.s32.totalorder %s1606_s11, 4 }
   0x9   : > { %p1713_p3 = scmp.eq.s32.totalorder %s1304_s12, 0  ;;  %s1608_s17 = smov [#allocation10]  }
   0xa   : > { %s1962_s14 = smov (%p33_p1, %s31_s14), 0  ;;  %p1719_p4 = pnand %p1306_p0, %p117_p2 }
   0xb   : > { %s1954_s15 = scalar_select %p1713_p3, 1, 0 }
   0xc   : > { %s130_s18 = sshll.u32 %s1608_s17, 4  ;;  %p1337_p5 = pneg %p1719_p4  ;;  %s131_s18 = int_to_ptr.vmem [resolvable:$true] %s130_s18 }
   0xd   : > { %p1350_p6 = scmp.lt.s32.totalorder %s1606_s11, 3  ;;  %p1351_p8 = scmp.eq.s32.totalorder %s1606_s11, 0 }
   0xe   : > { %p1728_p7 = pnand %p1713_p3, %p1337_p5  ;;  %s1609_s20 = smov [#allocation7]  }
   0xf   : > { %s154_s21 = sshll.u32 %s1609_s20, 4  ;;  %s1507_s22 = scalar_lea.vmem %s131_s18, 128  ;;  %s155_s21 = int_to_ptr.vmem [resolvable:$true] %s154_s21 }
  0x10   : > { %p1498_p9 = pneg %p1728_p7  ;;  %p1508_p10 = scmp.ne.s32.totalorder %s131_s18, %s1507_s22 }
  0x11   : > { %p1515_p13 = scmp.lt.s32.totalorder %s131_s18, %s131_s18  ;;  %p1516_p0 = scmp.lt.s32.totalorder %s1507_s22, %s1507_s22 }
  0x12   : > { %p1510_p11 = pnand %p1508_p10, %p1498_p9 }
  0x13   : > { %p1517_p1 = por %p1516_p0, %p1515_p13 }
  0x14   : > { %p1511_p12 = pneg %p1510_p11 }
  0x16   : > { %p1518_p2 = pnand %p1517_p1, %p1511_p12 }
  0x18   : > { %1521 = shalt.err (!%p1518_p2)
}
  0x19   : > { %1340 = dma.hbm_to_vmem [thread:$0]  (!%p1728_p7), %s1950_s1, 128, %s131_s18, [#allocation11]  }
  0x1a   : > { %p1342_p5 = pnand %p1351_p8, %p1350_p6  ;;  %s1533_s25 = scalar_lea.vmem %s155_s21, 32 }
  0x1b   : > { %p1534_p9 = scmp.ne.s32.totalorder %s155_s21, %s1533_s25  ;;  %s1540_s26 = scalar_lea.vmem %s155_s21, 64 }
  0x1c   : > { %p1524_p3 = pneg %p1342_p5  ;;  %p1541_p12 = scmp.lt.s32.totalorder %s155_s21, %s155_s21 }
  0x1d   : > { %p1542_p13 = scmp.lt.s32.totalorder %s1540_s26, %s1533_s25 }
  0x1e   : > { %p1536_p10 = pnand %p1534_p9, %p1524_p3 }
  0x1f   : > { %p1543_p0 = por %p1542_p13, %p1541_p12 }
  0x20   : > { %p1537_p11 = pneg %p1536_p10 }
  0x22   : > { %p1544_p1 = pnand %p1543_p0, %p1537_p11 }
  0x24   : > { %1547 = shalt.err (!%p1544_p1)
}
  0x25   : > { %1344 = dma.hbm_to_vmem [thread:$0]  (!%p1342_p5), %s1949_s0, 32, %s155_s21, [#allocation8]  }
  0x26   : > { %163 = sbr.rel (%p1719_p4) target bundleno = 2066 (0x812), region = 28  ;;  %p1957_p6 = scmp.ne.s32.totalorder (!%p1719_p4), %s1954_s15, 0 }
  0x2b   : > { %1585 = dma.done.wait (%p1957_p6), [#allocation8], 32  }
  0x2c   : > { %1587 = vsyncadd (%p1957_p6), [#allocation8], 4294967264 }
  0x2d   : > { %1589 = dma.done.wait (%p1957_p6), [#allocation11], 128  }
  0x2e   : > { %1591 = vsyncadd (%p1957_p6), [#allocation11], 4294967168  ;;  %p199_p3 = scmp.eq.s32.totalorder %s1598_s9, 0  ;;  %v1758_v0 = vld [vmem:[#allocation10] sm:$0xff] }
  0x2f   : > { %vm207_vm0 = vcmask (%p199_p3), 130048   ;;  %v1610_v1 = vmov (%p199_p3), 0.0  }
  0x30   : > { %204 = sbr.rel (!%p199_p3) target bundleno = 53 (0x35), region = 40  ;;  %205 = vst [vmem:[#allocation2] sm:$0xff] (%p199_p3), %v1610_v1  ;;  %206 = vst [vmem:[#allocation2 + $0x8] sm:$0xff] (%p199_p3), %v1610_v1 }
  0x31   : > { %209 = vst [vmem:[#allocation2 + $0x18] sm:$0xff] (%p199_p3), %v1610_v1  ;;  %210 = vst [vmem:[#allocation2 + $0x20] sm:$0xff] (%p199_p3), %v1610_v1 }
  0x32   : > { %212 = vst.msk [vmem:[#allocation4] sm:$0xff] (%p199_p3), %vm207_vm0, %v1610_v1  ;;  %213 = vst.msk [vmem:[#allocation5] sm:$0xff] (%p199_p3), %vm207_vm0, %v1610_v1 }
  0x35 PF: > { %p1314_p4 = scmp.ne.s32.totalorder %s1598_s9, 0 }
  0x36   : > { %s1621_s29 = smov (!%p1314_p4), 127   ;;  %s1622_s30 = smov (!%p1314_p4), 126  }
  0x37   : > { %234 = sbr.rel (%p1314_p4) target bundleno = 490 (0x1ea), region = 48  ;;  %s1623_s3 = smov (!%p1314_p4), 125  }
  0x38   : > { %s1624_s4 = smov (!%p1314_p4), 124   ;;  %s1625_s5 = smov (!%p1314_p4), 123  }
  0x39   : > { %s1626_s6 = smov (!%p1314_p4), 122   ;;  %s1627_s7 = smov (!%p1314_p4), 121  }
  0x3a   : > { %s1628_s8 = smov (!%p1314_p4), 8  }
  0x3c   : > { %v1611_v2 = vmov 1   ;;  %v1612_v3 = vmov 3   ;;  %v248_v4 = vlaneseq  ;;  %v1315_v5 = vld.sshfl [vmem:[#allocation7] sm:$0x11 pattern:$0x75316420] }
  0x3d   : > { %1449 = vset.pattern.permute.xlu0 %v1611_v2  ;;  %1451 = vset.pattern.permute.xlu1 %v1612_v3  ;;  %v1613_v6 = vmov 1966171168   ;;  %v1614_v9 = vmov 2   ;;  %v1615_v10 = vmov 4   ;;  %v244_v12 = vcombine.high %v1315_v5, %v1315_v5  ;;  %v1774_v24 = vld [vmem:[#allocation2] sm:$0xff]  ;;  %v1776_v25 = vld [vmem:[#allocation2 + $0x18] sm:$0xff] }
  0x3e   : > { %295 = vperm.xlu0 %1449, %v1758_v0   ;;  %357 = vperm.xlu1 %1451, %v1758_v0   ;;  %v246_v7 = vunpack.c.l.s4 %v1613_v6  ;;  %v249_v8 = vshrl.u32 %v248_v4, 7  ;;  %v1616_v17 = vmov 5   ;;  %v1617_v18 = vmov 6  }
  0x3f   : > { %vm269_vm1 = vcmask 130048   ;;  %v1618_v21 = vmov 7   ;;  %v1619_v22 = vmov 8   ;;  %v1620_v23 = vmov 0  }
  0x40   : > { %v247_v11 = vunpack.c.0.s8 %v246_v7  ;;  %v261_v14 = vsub.s32 0, %v249_v8  ;;  %vm314_vm2 = vcmask 1039360   ;;  %vm345_vm3 = vcmask 1031168  }
  0x41   : > { %vm376_vm4 = vcmask 1022976   ;;  %vm407_vm5 = vcmask 1014784   ;;  %vm438_vm6 = vcmask 1006592   ;;  %vm469_vm7 = vcmask 998400  }
  0x42   : > { %1450 = vset.pattern.permute.xlu0 %v1614_v9  ;;  %1452 = vset.pattern.permute.xlu1 %v1615_v10  ;;  %v250_v13 = vsub.s32 %v247_v11, %v249_v8  ;;  %vm500_vm8 = vcmask 990208   ;;  %vm523_vm9 = vcmask 64512   ;;  %vm533_vm10 = vcmask 1048512  }
  0x43   : > { %326 = vperm.xlu0 %1450, %v1758_v0   ;;  %388 = vperm.xlu1 %1452, %v1758_v0  }
  0x44   : > { %v251_v15 = vrot.slane %v1315_v5, %v250_v13  ;;  %v258_v16 = vrot.slane %v244_v12, %v250_v13 }
  0x46   : > { %v262_v19 = vrot.slane %v251_v15, %v261_v14  ;;  %v266_v20 = vrot.slane %v258_v16, %v261_v14 }
  0x47   : > { %1453 = vset.pattern.permute.xlu1 %v1616_v17  ;;  %1454 = vset.pattern.permute.xlu0 %v1617_v18 }
  0x48   : > { %419 = vperm.xlu1 %1453, %v1758_v0   ;;  %450 = vperm.xlu0 %1454, %v1758_v0   ;;  %270 = vst.msk [vmem:[#allocation2 + $0x8] sm:$0xff] %vm269_vm1, %v262_v19  ;;  %271 = vst.msk [vmem:[#allocation2 + $0x20] sm:$0xff] %vm269_vm1, %v266_v20 }
  0x4c   : > { %1455 = vset.pattern.permute.xlu1 %v1618_v21  ;;  %1457 = vset.pattern.permute.xlu0 %v1619_v22 }
  0x4d   : > { %481 = vperm.xlu1 %1455, %v1758_v0   ;;  %274 = vperm.xlu0 %1457, %v1758_v0  }
  0x4f   : > { %v1780_v29 = vld [vmem:[#allocation2 + $0x8] sm:$0xff]  ;;  %v1784_v33 = vld [vmem:[#allocation2 + $0x20] sm:$0xff] }
  0x51   : > { %1456 = vset.pattern.permute.xlu1 %v1620_v23  ;;  %1458 = vset.pattern.permute.xlu0 %v1618_v21 }
  0x52   : > { %283 = vperm.xlu1 %1456, %v1758_v0  }
  0xb9   : > { %v296_v26 = vpop.permute.xlu0 %295  ;;  %v358_v36 = vpop.permute.xlu1 %357 }
  0xba   : > { %v298_v27 = vmul.f32 %v296_v26, %v1774_v24  ;;  %v300_v28 = vmul.f32 %v296_v26, %v1776_v25  ;;  %v299_v30 = vmul.f32 %v296_v26, %v1780_v29  ;;  %v301_v35 = vmul.f32 %v296_v26, %v1784_v33 }
  0xbb   : > { %v360_v38 = vmul.f32 %v358_v36, %v1774_v24  ;;  %v362_v39 = vmul.f32 %v358_v36, %v1776_v25  ;;  %v361_v42 = vmul.f32 %v358_v36, %v1780_v29  ;;  %v363_v45 = vmul.f32 %v358_v36, %v1784_v33 }
  0xbc   : > { %306 = vrot.lane.b32.xlu1 %v298_v27, %s1621_s29  ;;  %310 = vrot.lane.b32.xlu0 %v300_v28, %s1621_s29 }
  0xbe   : > { %v327_v31 = vpop.permute.xlu0 %326  ;;  %v389_v41 = vpop.permute.xlu1 %388 }
  0xbf   : > { %v329_v32 = vmul.f32 %v327_v31, %v1774_v24  ;;  %v331_v34 = vmul.f32 %v327_v31, %v1776_v25  ;;  %v330_v37 = vmul.f32 %v327_v31, %v1780_v29  ;;  %v332_v40 = vmul.f32 %v327_v31, %v1784_v33 }
  0xc0   : > { %308 = vrot.lane.b32.xlu1 %v299_v30, %s1621_s29  ;;  %v391_v43 = vmul.f32 %v389_v41, %v1774_v24  ;;  %v393_v44 = vmul.f32 %v389_v41, %v1776_v25  ;;  %v392_v47 = vmul.f32 %v389_v41, %v1780_v29  ;;  %v394_v50 = vmul.f32 %v389_v41, %v1784_v33 }
  0xc1   : > { %337 = vrot.lane.b32.xlu0 %v329_v32, %s1622_s30 }
  0xc3   : > { %v420_v46 = vpop.permute.xlu1 %419  ;;  %v451_v51 = vpop.permute.xlu0 %450 }
  0xc4   : > { %312 = vrot.lane.b32.xlu1 %v301_v35, %s1621_s29  ;;  %v422_v48 = vmul.f32 %v420_v46, %v1774_v24  ;;  %v424_v49 = vmul.f32 %v420_v46, %v1776_v25  ;;  %v423_v52 = vmul.f32 %v420_v46, %v1780_v29  ;;  %v453_v53 = vmul.f32 %v451_v51, %v1774_v24 }
  0xc5   : > { %341 = vrot.lane.b32.xlu0 %v331_v34, %s1622_s30  ;;  %v455_v54 = vmul.f32 %v451_v51, %v1776_v25  ;;  %v425_v55 = vmul.f32 %v420_v46, %v1784_v33  ;;  %v454_v57 = vmul.f32 %v451_v51, %v1780_v29  ;;  %v456_v60 = vmul.f32 %v451_v51, %v1784_v33 }
  0xc8   : > { %339 = vrot.lane.b32.xlu1 %v330_v37, %s1622_s30  ;;  %v482_v56 = vpop.permute.xlu1 %481  ;;  %v275_v1 = vpop.permute.xlu0 %274 }
  0xc9   : > { %368 = vrot.lane.b32.xlu0 %v360_v38, %s1623_s3  ;;  %v484_v58 = vmul.f32 %v482_v56, %v1774_v24  ;;  %v486_v59 = vmul.f32 %v482_v56, %v1776_v25  ;;  %v485_v61 = vmul.f32 %v482_v56, %v1780_v29  ;;  %v487_v62 = vmul.f32 %v482_v56, %v1784_v33 }
  0xcc   : > { %343 = vrot.lane.b32.xlu1 %v332_v40, %s1622_s30 }
  0xcd   : > { %372 = vrot.lane.b32.xlu0 %v362_v39, %s1623_s3  ;;  %v284_v63 = vpop.permute.xlu1 %283 }
  0xce   : > { %v287_v20 = vmul.f32 %v284_v63, %v1780_v29  ;;  %v286_v21 = vmul.f32 %v284_v63, %v1774_v24  ;;  %v289_v28 = vmul.f32 %v284_v63, %v1784_v33  ;;  %v288_v30 = vmul.f32 %v284_v63, %v1776_v25 }
  0xd0   : > { %370 = vrot.lane.b32.xlu1 %v361_v42, %s1623_s3  ;;  %v291_v26 = vadd.f32 %v287_v20, %v275_v1  ;;  %v290_v31 = vadd.f32 %v286_v21, %v275_v1  ;;  %v293_v24 = vadd.f32 %v289_v28, %v275_v1  ;;  %v292_v39 = vadd.f32 %v288_v30, %v275_v1 }
  0xd1   : > { %399 = vrot.lane.b32.xlu0 %v391_v43, %s1624_s4 }
  0xd4   : > { %374 = vrot.lane.b32.xlu1 %v363_v45, %s1623_s3 }
  0xd5   : > { %403 = vrot.lane.b32.xlu0 %v393_v44, %s1624_s4 }
  0xd8   : > { %401 = vrot.lane.b32.xlu1 %v392_v47, %s1624_s4 }
  0xd9   : > { %430 = vrot.lane.b32.xlu0 %v422_v48, %s1625_s5 }
  0xdc   : > { %405 = vrot.lane.b32.xlu1 %v394_v50, %s1624_s4 }
  0xdd   : > { %434 = vrot.lane.b32.xlu0 %v424_v49, %s1625_s5 }
  0xe0   : > { %432 = vrot.lane.b32.xlu1 %v423_v52, %s1625_s5 }
  0xe1   : > { %461 = vrot.lane.b32.xlu0 %v453_v53, %s1626_s6 }
  0xe4   : > { %436 = vrot.lane.b32.xlu1 %v425_v55, %s1625_s5 }
  0xe5   : > { %465 = vrot.lane.b32.xlu0 %v455_v54, %s1626_s6 }
  0xe8   : > { %463 = vrot.lane.b32.xlu1 %v454_v57, %s1626_s6 }
  0xe9   : > { %492 = vrot.lane.b32.xlu0 %v484_v58, %s1627_s7 }
  0xec   : > { %467 = vrot.lane.b32.xlu1 %v456_v60, %s1626_s6 }
  0xed   : > { %496 = vrot.lane.b32.xlu0 %v486_v59, %s1627_s7 }
  0xf0   : > { %494 = vrot.lane.b32.xlu1 %v485_v61, %s1627_s7 }
  0xf4   : > { %498 = vrot.lane.b32.xlu1 %v487_v62, %s1627_s7 }
 0x12e   : > { %v307_v2 = vpop.permute.xlu1 %306  ;;  %v311_v3 = vpop.permute.xlu0 %310 }
 0x132   : > { %v309_v4 = vpop.permute.xlu1 %308 }
 0x133   : > { %v338_v5 = vpop.permute.xlu0 %337  ;;  %v315_v27 = vsel %vm314_vm2, %v307_v2, %v309_v4  ;;  %v322_v34 = vadd.f32 %v309_v4, %v291_v26 }
 0x134   : > { %v321_v29 = vadd.f32 %v315_v27, %v290_v31 }
 0x136   : > { %v313_v6 = vpop.permute.xlu1 %312 }
 0x137   : > { %v342_v7 = vpop.permute.xlu0 %341  ;;  %v316_v36 = vsel %vm314_vm2, %v311_v3, %v313_v6  ;;  %v324_v25 = vadd.f32 %v313_v6, %v293_v24 }
 0x138   : > { %v323_v45 = vadd.f32 %v316_v36, %v292_v39  ;;  %v532_v39 = vld [vmem:[#allocation4] sm:$0xff] }
 0x13a   : > { %v340_v8 = vpop.permute.xlu1 %339 }
 0x13b   : > { %v369_v9 = vpop.permute.xlu0 %368  ;;  %v346_v35 = vsel %vm345_vm3, %v338_v5, %v340_v8  ;;  %v353_v37 = vadd.f32 %v340_v8, %v322_v34 }
 0x13c   : > { %v352_v40 = vadd.f32 %v346_v35, %v321_v29 }
 0x13e   : > { %v344_v10 = vpop.permute.xlu1 %343 }
 0x13f   : > { %v373_v11 = vpop.permute.xlu0 %372  ;;  %v347_v42 = vsel %vm345_vm3, %v342_v7, %v344_v10  ;;  %v355_v47 = vadd.f32 %v344_v10, %v324_v25 }
 0x140   : > { %v354_v51 = vadd.f32 %v347_v42, %v323_v45  ;;  %v550_v42 = vld [vmem:[#allocation5] sm:$0xff] }
 0x142   : > { %v371_v12 = vpop.permute.xlu1 %370 }
 0x143   : > { %v400_v13 = vpop.permute.xlu0 %399  ;;  %v377_v38 = vsel %vm376_vm4, %v369_v9, %v371_v12  ;;  %v384_v43 = vadd.f32 %v371_v12, %v353_v37 }
 0x144   : > { %v383_v46 = vadd.f32 %v377_v38, %v352_v40 }
 0x146   : > { %v375_v14 = vpop.permute.xlu1 %374 }
 0x147   : > { %v404_v15 = vpop.permute.xlu0 %403  ;;  %v378_v48 = vsel %vm376_vm4, %v373_v11, %v375_v14  ;;  %v386_v54 = vadd.f32 %v375_v14, %v355_v47 }
 0x148   : > { %v385_v58 = vadd.f32 %v378_v48, %v354_v51 }
 0x14a   : > { %v402_v16 = vpop.permute.xlu1 %401 }
 0x14b   : > { %v431_v17 = vpop.permute.xlu0 %430  ;;  %v408_v44 = vsel %vm407_vm5, %v400_v13, %v402_v16  ;;  %v415_v49 = vadd.f32 %v402_v16, %v384_v43 }
 0x14c   : > { %v414_v52 = vadd.f32 %v408_v44, %v383_v46 }
 0x14e   : > { %v406_v18 = vpop.permute.xlu1 %405 }
 0x14f   : > { %v435_v19 = vpop.permute.xlu0 %434  ;;  %v409_v55 = vsel %vm407_vm5, %v404_v15, %v406_v18  ;;  %v417_v61 = vadd.f32 %v406_v18, %v386_v54 }
 0x150   : > { %v416_v1 = vadd.f32 %v409_v55, %v385_v58 }
 0x152   : > { %v433_v22 = vpop.permute.xlu1 %432 }
 0x153   : > { %v462_v23 = vpop.permute.xlu0 %461  ;;  %v439_v50 = vsel %vm438_vm6, %v431_v17, %v433_v22  ;;  %v446_v56 = vadd.f32 %v433_v22, %v415_v49 }
 0x154   : > { %v445_v59 = vadd.f32 %v439_v50, %v414_v52 }
 0x156   : > { %v437_v32 = vpop.permute.xlu1 %436 }
 0x157   : > { %v466_v33 = vpop.permute.xlu0 %465  ;;  %v440_v62 = vsel %vm438_vm6, %v435_v19, %v437_v32  ;;  %v448_v4 = vadd.f32 %v437_v32, %v417_v61 }
 0x158   : > { %v447_v8 = vadd.f32 %v440_v62, %v416_v1 }
 0x15a   : > { %v464_v41 = vpop.permute.xlu1 %463 }
 0x15b   : > { %v470_v57 = vsel %vm469_vm7, %v462_v23, %v464_v41  ;;  %v493_v60 = vpop.permute.xlu0 %492  ;;  %v477_v63 = vadd.f32 %v464_v41, %v446_v56 }
 0x15c   : > { %v476_v2 = vadd.f32 %v470_v57, %v445_v59 }
 0x15e   : > { %v468_v53 = vpop.permute.xlu1 %467 }
 0x15f   : > { %v471_v5 = vsel %vm469_vm7, %v466_v33, %v468_v53  ;;  %v479_v10 = vadd.f32 %v468_v53, %v448_v4  ;;  %v497_v12 = vpop.permute.xlu0 %496 }
 0x160   : > { %v478_v11 = vadd.f32 %v471_v5, %v447_v8 }
 0x162   : > { %v495_v3 = vpop.permute.xlu1 %494 }
 0x163   : > { %v501_v6 = vsel %vm500_vm8, %v493_v60, %v495_v3  ;;  %v508_v7 = vadd.f32 %v495_v3, %v477_v63 }
 0x164   : > { %v507_v9 = vadd.f32 %v501_v6, %v476_v2 }
 0x165   : > { %517 = vrot.lane.b32.xlu1 %v508_v7, %s1628_s8  ;;  %v552_v14 = vmul.f32 %v508_v7, %v508_v7  ;;  %v537_v20 = vsel %vm523_vm9, %v508_v7, 0.0 }
 0x166   : > { %515 = vrot.lane.b32.xlu0 %v507_v9, %s1628_s8  ;;  %v499_v13 = vpop.permute.xlu1 %498  ;;  %v551_v18 = vmul.f32 %v507_v9, %v507_v9  ;;  %v534_v23 = vsel %vm533_vm10, %v507_v9, 0.0 }
 0x167   : > { %v502_v15 = vsel %vm500_vm8, %v497_v12, %v499_v13  ;;  %v510_v16 = vadd.f32 %v499_v13, %v479_v10  ;;  %v558_v30 = vsel %vm523_vm9, %v552_v14, 0.0 }
 0x168   : > { %v509_v17 = vadd.f32 %v502_v15, %v478_v11  ;;  %v555_v34 = vsel %vm533_vm10, %v551_v18, 0.0 }
 0x169   : > { %v554_v19 = vmul.f32 %v510_v16, %v510_v16  ;;  %v538_v21 = vsel %vm523_vm9, %v510_v16, 0.0 }
 0x16a   : > { %v539_v22 = vadd.f32 %v538_v21, %v537_v20  ;;  %v535_v26 = vsel %vm533_vm10, %v509_v17, 0.0  ;;  %v553_v27 = vmul.f32 %v509_v17, %v509_v17 }
 0x16b   : > { %v536_v28 = vadd.f32 %v535_v26, %v534_v23  ;;  %v559_v31 = vsel %vm523_vm9, %v554_v19, 0.0 }
 0x16c   : > { %544 = vrot.lane.b32.xlu1 %v539_v22, %s1628_s8  ;;  %v560_v32 = vadd.f32 %v559_v31, %v558_v30  ;;  %v556_v35 = vsel %vm533_vm10, %v553_v27, 0.0 }
 0x16d   : > { %542 = vrot.lane.b32.xlu0 %v536_v28, %s1628_s8  ;;  %v557_v29 = vadd.f32 %v556_v35, %v555_v34 }
 0x170   : > { %565 = vrot.lane.b32.xlu1 %v560_v32, %s1628_s8 }
 0x171   : > { %563 = vrot.lane.b32.xlu0 %v557_v29, %s1628_s8 }
 0x174   : > { %521 = vrot.lane.b32.xlu1 %v510_v16, %s1628_s8 }
 0x175   : > { %519 = vrot.lane.b32.xlu0 %v509_v17, %s1628_s8 }
 0x1d7   : > { %v518_v24 = vpop.permute.xlu1 %517 }
 0x1d8   : > { %v516_v36 = vpop.permute.xlu0 %515 }
 0x1d9   : > { %v524_v37 = vsel %vm523_vm9, %v516_v36, %v518_v24 }
 0x1da   : > { %530 = vst.msk [vmem:[#allocation3] sm:$0xff] %vm269_vm1, %v524_v37 }
 0x1de   : > { %v545_v38 = vpop.permute.xlu1 %544 }
 0x1df   : > { %v543_v40 = vpop.permute.xlu0 %542 }
 0x1e0   : > { %v546_v33 = vsel %vm523_vm9, %v543_v40, %v545_v38 }
 0x1e1   : > { %v548_v41 = vadd.f32 %v546_v33, %v532_v39 }
 0x1e2   : > { %v566_v25 = vpop.permute.xlu1 %565 }
 0x1e3   : > { %549 = vst.msk [vmem:[#allocation4] sm:$0xff] %vm269_vm1, %v548_v41  ;;  %v564_v43 = vpop.permute.xlu0 %563 }
 0x1e4   : > { %v567_v44 = vsel %vm523_vm9, %v564_v43, %v566_v25 }
 0x1e5   : > { %v569_v45 = vadd.f32 %v567_v44, %v550_v42 }
 0x1e6   : > { %v522_v46 = vpop.permute.xlu1 %521 }
 0x1e7   : > { %570 = vst.msk [vmem:[#allocation5] sm:$0xff] %vm269_vm1, %v569_v45  ;;  %v520_v47 = vpop.permute.xlu0 %519 }
 0x1e8   : > { %v525_v48 = vsel %vm523_vm9, %v520_v47, %v522_v46 }
 0x1e9   : > { %531 = vst.msk [vmem:[#allocation3 + $0x8] sm:$0xff] %vm269_vm1, %v525_v48 }
 0x1ea PF: > { %572 = sbr.rel (!%p199_p3) target bundleno = 1282 (0x502), region = 52  ;;  %v1629_v49 = vmov (%p199_p3), 1   ;;  %v1630_v50 = vmov (%p199_p3), 3   ;;  %v1631_v51 = vmov (%p199_p3), 2   ;;  %v1632_v52 = vmov (%p199_p3), 4   ;;  %v590_v58 = vld [vmem:[#allocation2 + $0x8] sm:$0xff] (%p199_p3) }
 0x1eb   : > { %1459 = vset.pattern.permute.xlu0 (%p199_p3), %v1629_v49  ;;  %1461 = vset.pattern.permute.xlu1 (%p199_p3), %v1630_v50  ;;  %v1633_v53 = vmov (%p199_p3), 5   ;;  %v1634_v54 = vmov (%p199_p3), 6   ;;  %v1635_v55 = vmov (%p199_p3), 7   ;;  %v1636_v56 = vmov (%p199_p3), 8   ;;  %v591_v62 = vld [vmem:[#allocation2 + $0x20] sm:$0xff] (%p199_p3)  ;;  %s1638_s15 = smov (%p199_p3), 127  }
 0x1ec   : > { %601 = vperm.xlu0 (%p199_p3), %1459, %v1758_v0   ;;  %633 = vperm.xlu1 (%p199_p3), %1461, %v1758_v0   ;;  %v1637_v57 = vmov (%p199_p3), 0   ;;  %s1639_s16 = smov (%p199_p3), 126   ;;  %s1640_s17 = smov (%p199_p3), 125   ;;  %vm574_vm11 = vcmask (%p199_p3), 130048   ;;  %vm720_vm12 = vcmask (%p199_p3), 72704   ;;  %vm758_vm13 = vcmask (%p199_p3), 7168  }
 0x1ed   : > { %s1641_s18 = smov (%p199_p3), 124   ;;  %s1642_s19 = smov (%p199_p3), 123  }
 0x1ee   : > { %s1643_s20 = smov (%p199_p3), 122   ;;  %s1644_s21 = smov (%p199_p3), 121  }
 0x1ef   : > { %s1645_s22 = smov 120   ;;  %s1646_s23 = smov 119  }
 0x1f0   : > { %1460 = vset.pattern.permute.xlu0 %v1631_v51  ;;  %1462 = vset.pattern.permute.xlu1 %v1632_v52  ;;  %s1647_s24 = smov 1   ;;  %s1648_s25 = smov 118  }
 0x1f1   : > { %617 = vperm.xlu0 %1460, %v1758_v0   ;;  %649 = vperm.xlu1 %1462, %v1758_v0  }
 0x1f5   : > { %1463 = vset.pattern.permute.xlu1 %v1633_v53  ;;  %1464 = vset.pattern.permute.xlu0 %v1634_v54  ;;  %v573_v54 = vld [vmem:[#allocation4] sm:$0xff] }
 0x1f6   : > { %665 = vperm.xlu1 %1463, %v1758_v0   ;;  %681 = vperm.xlu0 %1464, %v1758_v0  }
 0x1fa   : > { %1465 = vset.pattern.permute.xlu1 %v1635_v55  ;;  %1467 = vset.pattern.permute.xlu0 %v1636_v56 }
 0x1fb   : > { %697 = vperm.xlu1 %1465, %v1758_v0   ;;  %586 = vperm.xlu0 %1467, %v1758_v0  }
 0x1ff   : > { %1466 = vset.pattern.permute.xlu1 %v1637_v57  ;;  %1468 = vset.pattern.permute.xlu0 %v1635_v55  ;;  %v575_v55 = vsel %vm574_vm11, %v573_v54, 0.0 }
 0x200   : > { %593 = vperm.xlu1 %1466, %v1758_v0  }
 0x267   : > { %v602_v59 = vpop.permute.xlu0 %601  ;;  %v634_v61 = vpop.permute.xlu1 %633 }
 0x268   : > { %v604_v60 = vmul.f32 %v602_v59, %v590_v58  ;;  %v605_v63 = vmul.f32 %v602_v59, %v591_v62  ;;  %v636_v4 = vmul.f32 %v634_v61, %v590_v58  ;;  %v637_v7 = vmul.f32 %v634_v61, %v591_v62  ;;  %v579_v61 = vld [vmem:[#allocation5] sm:$0xff] }
 0x26a   : > { %608 = vrot.lane.b32.xlu1 %v604_v60, %s1638_s15 }
 0x26c   : > { %v618_v1 = vpop.permute.xlu0 %617  ;;  %v650_v3 = vpop.permute.xlu1 %649 }
 0x26d   : > { %v620_v2 = vmul.f32 %v618_v1, %v590_v58  ;;  %v621_v5 = vmul.f32 %v618_v1, %v591_v62  ;;  %v652_v6 = vmul.f32 %v650_v3, %v590_v58  ;;  %v653_v10 = vmul.f32 %v650_v3, %v591_v62 }
 0x26e   : > { %610 = vrot.lane.b32.xlu1 %v605_v63, %s1638_s15  ;;  %v580_v1 = vsel %vm574_vm11, %v579_v61, 0.0 }
 0x26f   : > { %624 = vrot.lane.b32.xlu0 %v620_v2, %s1639_s16 }
 0x271   : > { %v666_v8 = vpop.permute.xlu1 %665  ;;  %v682_v11 = vpop.permute.xlu0 %681 }
 0x272   : > { %626 = vrot.lane.b32.xlu1 %v621_v5, %s1639_s16  ;;  %v668_v9 = vmul.f32 %v666_v8, %v590_v58  ;;  %v684_v12 = vmul.f32 %v682_v11, %v590_v58  ;;  %v669_v13 = vmul.f32 %v666_v8, %v591_v62  ;;  %v685_v16 = vmul.f32 %v682_v11, %v591_v62 }
 0x273   : > { %640 = vrot.lane.b32.xlu0 %v636_v4, %s1640_s17 }
 0x276   : > { %642 = vrot.lane.b32.xlu1 %v637_v7, %s1640_s17  ;;  %v698_v14 = vpop.permute.xlu1 %697  ;;  %v587_v20 = vpop.permute.xlu0 %586 }
 0x277   : > { %656 = vrot.lane.b32.xlu0 %v652_v6, %s1641_s18  ;;  %v700_v15 = vmul.f32 %v698_v14, %v590_v58  ;;  %v701_v17 = vmul.f32 %v698_v14, %v591_v62 }
 0x27a   : > { %658 = vrot.lane.b32.xlu1 %v653_v10, %s1641_s18 }
 0x27b   : > { %672 = vrot.lane.b32.xlu0 %v668_v9, %s1642_s19  ;;  %v594_v18 = vpop.permute.xlu1 %593 }
 0x27c   : > { %v596_v23 = vmul.f32 %v594_v18, %v590_v58  ;;  %v597_v30 = vmul.f32 %v594_v18, %v591_v62 }
 0x27e   : > { %674 = vrot.lane.b32.xlu1 %v669_v13, %s1642_s19  ;;  %v598_v28 = vadd.f32 %v596_v23, %v587_v20  ;;  %v599_v35 = vadd.f32 %v597_v30, %v587_v20 }
 0x27f   : > { %688 = vrot.lane.b32.xlu0 %v684_v12, %s1643_s20 }
 0x282   : > { %690 = vrot.lane.b32.xlu1 %v685_v16, %s1643_s20 }
 0x283   : > { %704 = vrot.lane.b32.xlu0 %v700_v15, %s1644_s21 }
 0x286   : > { %706 = vrot.lane.b32.xlu1 %v701_v17, %s1644_s21 }
 0x2dc   : > { %v609_v19 = vpop.permute.xlu1 %608 }
 0x2dd   : > { %v614_v34 = vadd.f32 %v609_v19, %v598_v28 }
 0x2e0   : > { %v611_v21 = vpop.permute.xlu1 %610 }
 0x2e1   : > { %v625_v22 = vpop.permute.xlu0 %624  ;;  %v615_v36 = vadd.f32 %v611_v21, %v599_v35 }
 0x2e2   : > { %v630_v29 = vadd.f32 %v625_v22, %v614_v34 }
 0x2e4   : > { %v627_v26 = vpop.permute.xlu1 %626 }
 0x2e5   : > { %v641_v27 = vpop.permute.xlu0 %640  ;;  %v631_v39 = vadd.f32 %v627_v26, %v615_v36 }
 0x2e6   : > { %v646_v38 = vadd.f32 %v641_v27, %v630_v29 }
 0x2e8   : > { %v643_v31 = vpop.permute.xlu1 %642 }
 0x2e9   : > { %v657_v32 = vpop.permute.xlu0 %656  ;;  %v647_v41 = vadd.f32 %v643_v31, %v631_v39 }
 0x2ea   : > { %v662_v40 = vadd.f32 %v657_v32, %v646_v38 }
 0x2ec   : > { %v659_v24 = vpop.permute.xlu1 %658 }
 0x2ed   : > { %v673_v37 = vpop.permute.xlu0 %672  ;;  %v663_v43 = vadd.f32 %v659_v24, %v647_v41 }
 0x2ee   : > { %v678_v42 = vadd.f32 %v673_v37, %v662_v40 }
 0x2f0   : > { %v675_v33 = vpop.permute.xlu1 %674 }
 0x2f1   : > { %v689_v25 = vpop.permute.xlu0 %688  ;;  %v679_v46 = vadd.f32 %v675_v33, %v663_v43 }
 0x2f2   : > { %v694_v44 = vadd.f32 %v689_v25, %v678_v42 }
 0x2f4   : > { %v691_v45 = vpop.permute.xlu1 %690 }
 0x2f5   : > { %v705_v47 = vpop.permute.xlu0 %704  ;;  %v695_v49 = vadd.f32 %v691_v45, %v679_v46 }
 0x2f6   : > { %v710_v48 = vadd.f32 %v705_v47, %v694_v44 }
 0x2f8   : > { %v707_v50 = vpop.permute.xlu1 %706  ;;  %714 = vrot.lane.b32.xlu0 %v710_v48, %s1645_s22  ;;  %v729_v52 = vmul.f32 %v710_v48, %v710_v48 }
 0x2f9   : > { %v711_v51 = vadd.f32 %v707_v50, %v695_v49 }
 0x2fb   : > { %716 = vrot.lane.b32.xlu1 %v711_v51, %s1645_s22  ;;  %v730_v53 = vmul.f32 %v711_v51, %v711_v51 }
 0x2fc   : > { %733 = vrot.lane.b32.xlu0 %v729_v52, %s1645_s22 }
 0x2ff   : > { %735 = vrot.lane.b32.xlu1 %v730_v53, %s1645_s22 }
 0x31b   : > { %576 = vadd.xlane.f32.xlu0 %v575_v55 }
 0x36a   : > { %v715_v56 = vpop.permute.xlu0 %714 }
 0x36b   : > { %v721_v57 = vsel %vm720_vm12, %v715_v56, 0.0 }
 0x36c   : > { %722 = vadd.xlane.f32.xlu0 %v721_v57 }
 0x36d   : > { %v717_v58 = vpop.permute.xlu1 %716 }
 0x36e   : > { %v734_v59 = vpop.permute.xlu0 %733  ;;  %v724_v60 = vsel %vm720_vm12, %v717_v58, 0.0 }
 0x36f   : > { %725 = vadd.xlane.f32.xlu1 %v724_v60  ;;  %v739_v62 = vsel %vm720_vm12, %v734_v59, 0.0 }
 0x370   : > { %740 = vadd.xlane.f32.xlu0 %v739_v62 }
 0x371   : > { %v736_v63 = vpop.permute.xlu1 %735 }
 0x372   : > { %v742_v2 = vsel %vm720_vm12, %v736_v63, 0.0 }
 0x373   : > { %743 = vadd.xlane.f32.xlu1 %v742_v2 }
 0x374   : > { %581 = vadd.xlane.f32.xlu0 %v580_v1 }
 0x3a4   : > { %v577_v3 = vpop.xlane.xlu0 %576 }
 0x3f5   : > { %v723_v4 = vpop.xlane.xlu0 %722 }
 0x3f8   : > { %v726_v5 = vpop.xlane.xlu1 %725 }
 0x3f9   : > { %v727_v6 = vadd.f32 %v726_v5, %v723_v4  ;;  %v741_v7 = vpop.xlane.xlu0 %740 }
 0x3fb   : > { %v728_v8 = vadd.f32 %v727_v6, %v577_v3 }
 0x3fc   : > { %v744_v9 = vpop.xlane.xlu1 %743 }
 0x3fd   : > { %v747_v10 = vmul.f32 0.02, %v728_v8  ;;  %v745_v11 = vadd.f32 %v744_v9, %v741_v7  ;;  %v582_v12 = vpop.xlane.xlu0 %581 }
 0x3ff   : > { %v746_v13 = vadd.f32 %v745_v11, %v582_v12  ;;  %v749_v14 = vmul.f32 %v747_v10, %v747_v10 }
 0x401   : > { %v748_v15 = vmul.f32 0.02, %v746_v13 }
 0x403   : > { %v750_v16 = vsub.f32 %v748_v15, %v749_v14 }
 0x405   : > { %v751_v17 = vadd.f32 1e-05, %v750_v16 }
 0x407   : > { %1469 = vrsqrt.f32 %v751_v17 }
 0x414   : > { %v1470_v18 = vpop.eup %1469 }
 0x415   : > { %v753_v19 = vmul.f32 %v1470_v18, %v1758_v0 }
 0x417   : > { %755 = vrot.lane.b32.xlu0 %v753_v19, %s1646_s23  ;;  %v760_v20 = vmul.f32 %v753_v19, %v747_v10 }
 0x419   : > { %762 = vrot.lane.b32.xlu1 %v760_v20, %s1647_s24 }
 0x489   : > { %v756_v21 = vpop.permute.xlu0 %755 }
 0x48a   : > { %759 = vst.msk [vmem:[#allocation6] sm:$0xff] %vm758_vm13, %v756_v21 }
 0x48b   : > { %v763_v22 = vpop.permute.xlu1 %762 }
 0x48c   : > { %v765_v23 = vsub.f32 %v1758_v0, %v763_v22 }
 0x48e   : > { %767 = vrot.lane.b32.xlu1 %v765_v23, %s1648_s25 }
 0x500   : > { %v768_v26 = vpop.permute.xlu1 %767 }
 0x501   : > { %771 = vst.msk [vmem:[#allocation6 + $0x8] sm:$0xff] %vm758_vm13, %v768_v26 }
 0x502 PF: > { %p772_p7 = scmp.eq.s32.totalorder %s1598_s9, 1 }
 0x503   : > { %vm777_vm14 = vcmask (%p772_p7), 130048   ;;  %v1649_v27 = vmov (%p772_p7), 0.0  }
 0x504   : > { %776 = sbr.rel (!%p772_p7) target bundleno = 1289 (0x509), region = 56  ;;  %778 = vst.msk [vmem:[#allocation4] sm:$0xff] (%p772_p7), %vm777_vm14, %v1649_v27  ;;  %779 = vst.msk [vmem:[#allocation5] sm:$0xff] (%p772_p7), %vm777_vm14, %v1649_v27 }
 0x509 PF: > { %p1317_p8 = scmp.ne.s32.totalorder %s1598_s9, 1 }
 0x50b   : > { %782 = sbr.rel (%p1317_p8) target bundleno = 1461 (0x5b5), region = 60 }
 0x510   : > { %v787_v28 = vld [vmem:[#allocation6] sm:$0xff]  ;;  %v1650_v30 = vmov 11   ;;  %v1651_v31 = vmov 0   ;;  %v796_v32 = vld [vmem:[#allocation6 + $0x8] sm:$0xff]  ;;  %v1652_v34 = vmov 19   ;;  %v1653_v35 = vmov 12  }
 0x511   : > { %1472 = vset.pattern.permute.xlu1 %v1650_v30  ;;  %1471 = vset.pattern.permute.xlu0 %v1651_v31  ;;  %v1654_v29 = vmov 13   ;;  %v1655_v24 = vmov 15   ;;  %v1656_v36 = vmov 14   ;;  %v1657_v37 = vmov 18   ;;  %v785_v33 = vld [vmem:[#allocation3] sm:$0xff]  ;;  %v786_v41 = vld [vmem:[#allocation3 + $0x8] sm:$0xff] }
 0x512   : > { %824 = vperm.xlu1 %1472, %v1758_v0   ;;  %790 = vperm.xlu0 %1471, %v787_v28   ;;  %v1658_v38 = vmov 16   ;;  %v1659_v39 = vmov 17   ;;  %v815_v40 = vlaneseq  ;;  %vm806_vm15 = vcmask 130048  }
 0x514   : > { %v816_v45 = vshrl.u32 %v815_v40, 7 }
 0x516   : > { %1473 = vset.pattern.permute.xlu1 %v1652_v34  ;;  %799 = vperm.xlu0 %1471, %v796_v32   ;;  %v817_v49 = vsub.s32 0, %v816_v45  ;;  %v833_v51 = vsub.s32 1, %v816_v45  ;;  %v849_v54 = vsub.s32 2, %v816_v45  ;;  %v865_v61 = vsub.s32 3, %v816_v45 }
 0x517   : > { %811 = vperm.xlu1 %1473, %v1758_v0   ;;  %v881_v7 = vsub.s32 4, %v816_v45  ;;  %v897_v17 = vsub.s32 5, %v816_v45  ;;  %v913_v27 = vsub.s32 6, %v816_v45 }
 0x51a   : > { %1474 = vset.pattern.permute.xlu0 %v1653_v35  ;;  %v929_v35 = vsub.s32 7, %v816_v45 }
 0x51b   : > { %1475 = vset.pattern.permute.xlu1 %v1654_v29  ;;  %840 = vperm.xlu0 %1474, %v1758_v0  }
 0x51c   : > { %856 = vperm.xlu1 %1475, %v1758_v0  }
 0x51f   : > { %1477 = vset.pattern.permute.xlu0 %v1655_v24 }
 0x520   : > { %1476 = vset.pattern.permute.xlu1 %v1656_v36  ;;  %888 = vperm.xlu0 %1477, %v1758_v0  }
 0x521   : > { %872 = vperm.xlu1 %1476, %v1758_v0  }
 0x524   : > { %1480 = vset.pattern.permute.xlu0 %v1657_v37 }
 0x525   : > { %1478 = vset.pattern.permute.xlu1 %v1658_v38  ;;  %936 = vperm.xlu0 %1480, %v1758_v0  }
 0x526   : > { %904 = vperm.xlu1 %1478, %v1758_v0  }
 0x52a   : > { %1479 = vset.pattern.permute.xlu1 %v1659_v39 }
 0x52b   : > { %920 = vperm.xlu1 %1479, %v1758_v0  }
 0x58d   : > { %v825_v25 = vpop.permute.xlu1 %824  ;;  %v791_v42 = vpop.permute.xlu0 %790 }
 0x58e   : > { %v793_v43 = vmul.f32 %v791_v42, %v785_v33  ;;  %v794_v44 = vmul.f32 %v791_v42, %v786_v41 }
 0x591   : > { %v800_v46 = vpop.permute.xlu0 %799 }
 0x592   : > { %v802_v47 = vadd.f32 %v800_v46, %v793_v43  ;;  %v803_v48 = vadd.f32 %v800_v46, %v794_v44  ;;  %v812_v50 = vpop.permute.xlu1 %811 }
 0x594   : > { %v804_v52 = vmax.f32 %v802_v47, 0.0  ;;  %v805_v53 = vmax.f32 %v803_v48, 0.0 }
 0x596   : > { %v818_v55 = vrot.slane %v804_v52, %v817_v49  ;;  %v822_v56 = vrot.slane %v805_v53, %v817_v49  ;;  %807 = vst.msk [vmem:[#allocation3] sm:$0xff] %vm806_vm15, %v804_v52  ;;  %808 = vst.msk [vmem:[#allocation3 + $0x8] sm:$0xff] %vm806_vm15, %v805_v53  ;;  %v841_v58 = vpop.permute.xlu0 %840  ;;  %v834_v59 = vrot.slane %v804_v52, %v833_v51 }
 0x597   : > { %v857_v57 = vpop.permute.xlu1 %856  ;;  %v838_v60 = vrot.slane %v805_v53, %v833_v51  ;;  %v850_v1 = vrot.slane %v804_v52, %v849_v54  ;;  %v854_v2 = vrot.slane %v805_v53, %v849_v54  ;;  %v866_v8 = vrot.slane %v804_v52, %v865_v61  ;;  %v943_v54 = vld [vmem:[#allocation4] sm:$0xff] }
 0x598   : > { %v827_v62 = vmul.f32 %v825_v25, %v818_v55  ;;  %v828_v63 = vmul.f32 %v825_v25, %v822_v56  ;;  %v843_v5 = vmul.f32 %v841_v58, %v834_v59  ;;  %v870_v9 = vrot.slane %v805_v53, %v865_v61 }
 0x599   : > { %v844_v6 = vmul.f32 %v841_v58, %v838_v60  ;;  %v859_v10 = vmul.f32 %v857_v57, %v850_v1  ;;  %v860_v11 = vmul.f32 %v857_v57, %v854_v2  ;;  %v882_v21 = vrot.slane %v804_v52, %v881_v7 }
 0x59a   : > { %v829_v3 = vadd.f32 %v827_v62, %v812_v50  ;;  %v830_v4 = vadd.f32 %v828_v63, %v812_v50  ;;  %v886_v22 = vrot.slane %v805_v53, %v881_v7  ;;  %v898_v32 = vrot.slane %v804_v52, %v897_v17 }
 0x59b   : > { %v889_v18 = vpop.permute.xlu0 %888  ;;  %v902_v34 = vrot.slane %v805_v53, %v897_v17  ;;  %v914_v38 = vrot.slane %v804_v52, %v913_v27  ;;  %v918_v39 = vrot.slane %v805_v53, %v913_v27  ;;  %v930_v33 = vrot.slane %v804_v52, %v929_v35 }
 0x59c   : > { %v845_v12 = vadd.f32 %v843_v5, %v829_v3  ;;  %v846_v13 = vadd.f32 %v844_v6, %v830_v4  ;;  %v873_v14 = vpop.permute.xlu1 %872  ;;  %v891_v28 = vmul.f32 %v889_v18, %v882_v21  ;;  %v892_v30 = vmul.f32 %v889_v18, %v886_v22 }
 0x59d   : > { %v875_v15 = vmul.f32 %v873_v14, %v866_v8  ;;  %v876_v16 = vmul.f32 %v873_v14, %v870_v9  ;;  %v934_v41 = vrot.slane %v805_v53, %v929_v35  ;;  %v949_v53 = vld [vmem:[#allocation5] sm:$0xff] }
 0x59e   : > { %v861_v19 = vadd.f32 %v859_v10, %v845_v12  ;;  %v862_v20 = vadd.f32 %v860_v11, %v846_v13 }
 0x5a0   : > { %v877_v23 = vadd.f32 %v875_v15, %v861_v19  ;;  %v878_v26 = vadd.f32 %v876_v16, %v862_v20  ;;  %v937_v40 = vpop.permute.xlu0 %936 }
 0x5a1   : > { %v905_v31 = vpop.permute.xlu1 %904  ;;  %v939_v47 = vmul.f32 %v937_v40, %v930_v33  ;;  %v940_v48 = vmul.f32 %v937_v40, %v934_v41 }
 0x5a2   : > { %v893_v29 = vadd.f32 %v891_v28, %v877_v23  ;;  %v894_v24 = vadd.f32 %v892_v30, %v878_v26  ;;  %v907_v36 = vmul.f32 %v905_v31, %v898_v32  ;;  %v908_v37 = vmul.f32 %v905_v31, %v902_v34 }
 0x5a4   : > { %v909_v42 = vadd.f32 %v907_v36, %v893_v29  ;;  %v910_v43 = vadd.f32 %v908_v37, %v894_v24 }
 0x5a6   : > { %v921_v25 = vpop.permute.xlu1 %920 }
 0x5a7   : > { %v923_v44 = vmul.f32 %v921_v25, %v914_v38  ;;  %v924_v46 = vmul.f32 %v921_v25, %v918_v39 }
 0x5a9   : > { %v925_v49 = vadd.f32 %v923_v44, %v909_v42  ;;  %v926_v50 = vadd.f32 %v924_v46, %v910_v43 }
 0x5ab   : > { %v941_v51 = vadd.f32 %v939_v47, %v925_v49  ;;  %v942_v45 = vadd.f32 %v940_v48, %v926_v50 }
 0x5ad   : > { %v944_v55 = vsel %vm806_vm15, %v941_v51, 0.0  ;;  %v945_v56 = vsel %vm806_vm15, %v942_v45, 0.0  ;;  %v950_v57 = vmul.f32 %v941_v51, %v941_v51  ;;  %v951_v58 = vmul.f32 %v942_v45, %v942_v45 }
 0x5ae   : > { %v946_v52 = vadd.f32 %v945_v56, %v944_v55 }
 0x5af   : > { %v952_v59 = vsel %vm806_vm15, %v950_v57, 0.0  ;;  %v953_v60 = vsel %vm806_vm15, %v951_v58, 0.0 }
 0x5b0   : > { %v947_v61 = vadd.f32 %v946_v52, %v943_v54  ;;  %v954_v62 = vadd.f32 %v953_v60, %v952_v59 }
 0x5b2   : > { %948 = vst.msk [vmem:[#allocation4] sm:$0xff] %vm806_vm15, %v947_v61  ;;  %v955_v63 = vadd.f32 %v954_v62, %v949_v53 }
 0x5b4   : > { %956 = vst.msk [vmem:[#allocation5] sm:$0xff] %vm806_vm15, %v955_v63 }
 0x5b5 PF: > { %958 = sbr.rel (!%p772_p7) target bundleno = 1866 (0x74a), region = 64  ;;  %vm960_vm0 = vcmask (%p772_p7), 130048   ;;  %s1660_s26 = smov (%p772_p7), 1   ;;  %vm982_vm1 = vcmask (%p772_p7), 7168  }
 0x5b6   : > { %s1661_s27 = smov (%p772_p7), 108   ;;  %s1662_s28 = smov (%p772_p7), 107  }
 0x5b9   : > { %v959_v1 = vld [vmem:[#allocation4] sm:$0xff] (%p772_p7) }
 0x5ba   : > { %v961_v3 = vsel %vm960_vm0, %v959_v1, 0.0 }
 0x5bb   : > { %v965_v2 = vld [vmem:[#allocation5] sm:$0xff]  ;;  %962 = vadd.xlane.f32.xlu0 %v961_v3 }
 0x5bc   : > { %v966_v4 = vsel %vm960_vm0, %v965_v2, 0.0 }
 0x5bf   : > { %967 = vadd.xlane.f32.xlu0 %v966_v4 }
 0x644   : > { %v963_v5 = vpop.xlane.xlu0 %962 }
 0x645   : > { %v970_v6 = vmul.f32 0.03125, %v963_v5 }
 0x647   : > { %v972_v8 = vmul.f32 %v970_v6, %v970_v6 }
 0x648   : > { %v968_v7 = vpop.xlane.xlu0 %967 }
 0x649   : > { %v971_v9 = vmul.f32 0.03125, %v968_v7 }
 0x64b   : > { %v973_v10 = vsub.f32 %v971_v9, %v972_v8 }
 0x64d   : > { %v974_v11 = vadd.f32 1e-05, %v973_v10 }
 0x64f   : > { %1481 = vrsqrt.f32 %v974_v11 }
 0x65c   : > { %v1482_v12 = vpop.eup %1481 }
 0x65d   : > { %v976_v13 = vmul.f32 %v1482_v12, %v1758_v0 }
 0x65f   : > { %v984_v14 = vmul.f32 %v976_v13, %v970_v6 }
 0x661   : > { %986 = vrot.lane.b32.xlu1 %v984_v14, %s1660_s26 }
 0x665   : > { %978 = vrot.lane.b32.xlu1 %v976_v13, %s1661_s27 }
 0x6d3   : > { %v987_v15 = vpop.permute.xlu1 %986 }
 0x6d4   : > { %v989_v16 = vsub.f32 %v1758_v0, %v987_v15 }
 0x6d6   : > { %991 = vrot.lane.b32.xlu0 %v989_v16, %s1662_s28 }
 0x6d7   : > { %v979_v17 = vpop.permute.xlu1 %978 }
 0x6d8   : > { %983 = vst.msk [vmem:[#allocation6 + $0x10] sm:$0xff] %vm982_vm1, %v979_v17 }
 0x748   : > { %v992_v18 = vpop.permute.xlu0 %991 }
 0x749   : > { %995 = vst.msk [vmem:[#allocation6 + $0x18] sm:$0xff] %vm982_vm1, %v992_v18 }
 0x74a PF: > { %p1318_p2 = scmp.ne.s32.totalorder %s1598_s9, 2 }
 0x74c   : > { %999 = sbr.rel (%p1318_p2) target bundleno = 2053 (0x805), region = 68 }
 0x751   : > { %v1663_v19 = vmov 12   ;;  %v1664_v20 = vmov 11   ;;  %v1665_v21 = vmov 13   ;;  %v1666_v22 = vmov 19   ;;  %v1139_v32 = vld [vmem:[#allocation6 + $0x10] sm:$0xff]  ;;  %v1148_v29 = vld [vmem:[#allocation6 + $0x18] sm:$0xff] }
 0x752   : > { %1485 = vset.pattern.permute.xlu1 %v1663_v19  ;;  %1483 = vset.pattern.permute.xlu0 %v1664_v20  ;;  %v1667_v23 = vmov 14   ;;  %v1668_v26 = vmov 15   ;;  %v1669_v27 = vmov 16   ;;  %v1670_v28 = vmov 18   ;;  %v1902_v38 = vld [vmem:[#allocation3] sm:$0xff]  ;;  %v1904_v39 = vld [vmem:[#allocation3 + $0x8] sm:$0xff] }
 0x753   : > { %1035 = vperm.xlu1 %1485, %v1758_v0   ;;  %1019 = vperm.xlu0 %1483, %v1758_v0   ;;  %v1671_v30 = vmov 17   ;;  %v1672_v31 = vmov 22   ;;  %v1673_v34 = vmov 0   ;;  %v1674_v35 = vmov 23  }
 0x754   : > { %v1010_v24 = vlaneseq  ;;  %vm1172_vm2 = vcmask 130048   ;;  %vm1189_vm3 = vcmask 1041409   ;;  %vm1192_vm4 = vcmask 123904  }
 0x756   : > { %v1011_v36 = vshrl.u32 %v1010_v24, 7 }
 0x757   : > { %1486 = vset.pattern.permute.xlu1 %v1665_v21  ;;  %1484 = vset.pattern.permute.xlu0 %v1666_v22 }
 0x758   : > { %1051 = vperm.xlu1 %1486, %v1758_v0   ;;  %1006 = vperm.xlu0 %1484, %v1758_v0   ;;  %v1012_v37 = vsub.s32 0, %v1011_v36  ;;  %v1028_v40 = vsub.s32 1, %v1011_v36  ;;  %v1044_v43 = vsub.s32 2, %v1011_v36  ;;  %v1060_v48 = vsub.s32 3, %v1011_v36 }
 0x759   : > { %v1076_v54 = vsub.s32 4, %v1011_v36  ;;  %v1092_v59 = vsub.s32 5, %v1011_v36  ;;  %v1108_v11 = vsub.s32 6, %v1011_v36  ;;  %v1124_v12 = vsub.s32 7, %v1011_v36 }
 0x75a   : > { %v1013_v33 = vrot.slane %v1902_v38, %v1012_v37  ;;  %v1017_v41 = vrot.slane %v1904_v39, %v1012_v37  ;;  %v1029_v44 = vrot.slane %v1902_v38, %v1028_v40  ;;  %v1033_v46 = vrot.slane %v1904_v39, %v1028_v40 }
 0x75b   : > { %v1045_v49 = vrot.slane %v1902_v38, %v1044_v43  ;;  %v1049_v50 = vrot.slane %v1904_v39, %v1044_v43  ;;  %v1061_v52 = vrot.slane %v1902_v38, %v1060_v48  ;;  %v1065_v53 = vrot.slane %v1904_v39, %v1060_v48 }
 0x75c   : > { %1487 = vset.pattern.permute.xlu1 %v1667_v23  ;;  %1488 = vset.pattern.permute.xlu0 %v1668_v26  ;;  %v1077_v1 = vrot.slane %v1902_v38, %v1076_v54  ;;  %v1081_v2 = vrot.slane %v1904_v39, %v1076_v54  ;;  %v1093_v9 = vrot.slane %v1902_v38, %v1092_v59 }
 0x75d   : > { %1067 = vperm.xlu1 %1487, %v1758_v0   ;;  %1083 = vperm.xlu0 %1488, %v1758_v0   ;;  %v1097_v10 = vrot.slane %v1904_v39, %v1092_v59  ;;  %v1109_v18 = vrot.slane %v1902_v38, %v1108_v11  ;;  %v1113_v19 = vrot.slane %v1904_v39, %v1108_v11 }
 0x75e   : > { %v1125_v20 = vrot.slane %v1902_v38, %v1124_v12  ;;  %v1129_v21 = vrot.slane %v1904_v39, %v1124_v12 }
 0x761   : > { %1489 = vset.pattern.permute.xlu1 %v1669_v27  ;;  %1491 = vset.pattern.permute.xlu0 %v1670_v28 }
 0x762   : > { %1099 = vperm.xlu1 %1489, %v1758_v0   ;;  %1131 = vperm.xlu0 %1491, %v1758_v0  }
 0x766   : > { %1490 = vset.pattern.permute.xlu1 %v1671_v30  ;;  %1493 = vset.pattern.permute.xlu0 %v1672_v31 }
 0x767   : > { %1115 = vperm.xlu1 %1490, %v1758_v0   ;;  %1161 = vperm.xlu0 %1493, %v1758_v0  }
 0x76b   : > { %1492 = vset.pattern.permute.xlu1 %v1673_v34  ;;  %1495 = vset.pattern.permute.xlu0 %v1674_v35 }
 0x76c   : > { %1142 = vperm.xlu1 %1492, %v1139_v32  }
 0x770   : > { %1151 = vperm.xlu1 %1492, %v1148_v29  }
 0x774   : > { %1494 = vset.pattern.permute.xlu1 %v1674_v35 }
 0x775   : > { %1167 = vperm.xlu1 %1494, %v1758_v0  }
 0x7ce   : > { %v1036_v25 = vpop.permute.xlu1 %1035  ;;  %v1020_v42 = vpop.permute.xlu0 %1019 }
 0x7cf   : > { %v1022_v0 = vmul.f32 %v1020_v42, %v1013_v33  ;;  %v1023_v47 = vmul.f32 %v1020_v42, %v1017_v41  ;;  %v1038_v55 = vmul.f32 %v1036_v25, %v1029_v44  ;;  %v1039_v56 = vmul.f32 %v1036_v25, %v1033_v46 }
 0x7d3   : > { %v1052_v51 = vpop.permute.xlu1 %1051  ;;  %v1007_v45 = vpop.permute.xlu0 %1006 }
 0x7d4   : > { %v1024_v57 = vadd.f32 %v1022_v0, %v1007_v45  ;;  %v1025_v58 = vadd.f32 %v1023_v47, %v1007_v45  ;;  %v1054_v60 = vmul.f32 %v1052_v51, %v1045_v49  ;;  %v1055_v61 = vmul.f32 %v1052_v51, %v1049_v50 }
 0x7d6   : > { %v1040_v62 = vadd.f32 %v1038_v55, %v1024_v57  ;;  %v1041_v63 = vadd.f32 %v1039_v56, %v1025_v58 }
 0x7d8   : > { %v1068_v3 = vpop.permute.xlu1 %1067  ;;  %v1056_v4 = vadd.f32 %v1054_v60, %v1040_v62  ;;  %v1057_v5 = vadd.f32 %v1055_v61, %v1041_v63  ;;  %v1084_v6 = vpop.permute.xlu0 %1083 }
 0x7d9   : > { %v1070_v7 = vmul.f32 %v1068_v3, %v1061_v52  ;;  %v1071_v8 = vmul.f32 %v1068_v3, %v1065_v53  ;;  %v1086_v15 = vmul.f32 %v1084_v6, %v1077_v1  ;;  %v1087_v16 = vmul.f32 %v1084_v6, %v1081_v2 }
 0x7db   : > { %v1072_v13 = vadd.f32 %v1070_v7, %v1056_v4  ;;  %v1073_v14 = vadd.f32 %v1071_v8, %v1057_v5 }
 0x7dd   : > { %v1100_v17 = vpop.permute.xlu1 %1099  ;;  %v1088_v22 = vadd.f32 %v1086_v15, %v1072_v13  ;;  %v1089_v23 = vadd.f32 %v1087_v16, %v1073_v14  ;;  %v1132_v28 = vpop.permute.xlu0 %1131 }
 0x7de   : > { %v1102_v26 = vmul.f32 %v1100_v17, %v1093_v9  ;;  %v1103_v27 = vmul.f32 %v1100_v17, %v1097_v10  ;;  %v1134_v31 = vmul.f32 %v1132_v28, %v1125_v20  ;;  %v1135_v32 = vmul.f32 %v1132_v28, %v1129_v21 }
 0x7e0   : > { %v1104_v34 = vadd.f32 %v1102_v26, %v1088_v22  ;;  %v1105_v35 = vadd.f32 %v1103_v27, %v1089_v23 }
 0x7e2   : > { %v1116_v30 = vpop.permute.xlu1 %1115  ;;  %v1162_v48 = vpop.permute.xlu0 %1161 }
 0x7e3   : > { %v1118_v29 = vmul.f32 %v1116_v30, %v1109_v18  ;;  %v1119_v24 = vmul.f32 %v1116_v30, %v1113_v19 }
 0x7e5   : > { %v1120_v36 = vadd.f32 %v1118_v29, %v1104_v34  ;;  %v1121_v37 = vadd.f32 %v1119_v24, %v1105_v35 }
 0x7e7   : > { %v1143_v40 = vpop.permute.xlu1 %1142  ;;  %v1136_v33 = vadd.f32 %v1134_v31, %v1120_v36  ;;  %v1137_v41 = vadd.f32 %v1135_v32, %v1121_v37 }
 0x7e9   : > { %v1145_v25 = vmul.f32 %v1143_v40, %v1136_v33  ;;  %v1146_v42 = vmul.f32 %v1143_v40, %v1137_v41 }
 0x7eb   : > { %v1152_v43 = vpop.permute.xlu1 %1151 }
 0x7ec   : > { %v1154_v44 = vadd.f32 %v1152_v43, %v1145_v25  ;;  %v1155_v46 = vadd.f32 %v1152_v43, %v1146_v42 }
 0x7ee   : > { %v1156_v0 = vadd.f32 %v1154_v44, %v1902_v38  ;;  %v1157_v47 = vadd.f32 %v1155_v46, %v1904_v39 }
 0x7f0   : > { %v1158_v49 = vmax.f32 %v1156_v0, 0.0  ;;  %v1159_v50 = vmax.f32 %v1157_v47, 0.0  ;;  %v1168_v51 = vpop.permute.xlu1 %1167 }
 0x7f2   : > { %v1164_v45 = vmul.f32 %v1162_v48, %v1158_v49  ;;  %v1165_v54 = vmul.f32 %v1162_v48, %v1159_v50 }
 0x7f4   : > { %v1170_v55 = vadd.f32 %v1168_v51, %v1164_v45  ;;  %v1171_v56 = vadd.f32 %v1168_v51, %v1165_v54 }
 0x7f6   : > { %v1173_v57 = vsel %vm1172_vm2, %v1170_v55, 0.0  ;;  %v1180_v58 = vsel %vm1172_vm2, %v1171_v56, 0.0 }
 0x7f7   : > { %v1174_v52 = vrot.slane %v1173_v57, 4  ;;  %v1181_v53 = vrot.slane %v1180_v58, 4 }
 0x7f9   : > { %v1175_v59 = vadd.f32 %v1174_v52, %v1173_v57  ;;  %v1182_v60 = vadd.f32 %v1181_v53, %v1180_v58 }
 0x7fb   : > { %v1176_v61 = vrot.slane %v1175_v59, 2  ;;  %v1183_v62 = vrot.slane %v1182_v60, 2 }
 0x7fd   : > { %v1177_v38 = vadd.f32 %v1176_v61, %v1175_v59  ;;  %v1184_v63 = vadd.f32 %v1183_v62, %v1182_v60 }
 0x7ff   : > { %v1178_v39 = vrot.slane %v1177_v38, 1  ;;  %v1185_v1 = vrot.slane %v1184_v63, 1 }
 0x801   : > { %v1179_v2 = vadd.f32 %v1178_v39, %v1177_v38  ;;  %v1186_v3 = vadd.f32 %v1185_v1, %v1184_v63 }
 0x803   : > { %v1190_v4 = vsel %vm1189_vm3, %v1186_v3, %v1179_v2 }
 0x804   : > { %1193 = vst.msk [vmem:[#allocation12] sm:$0x3] %vm1192_vm4, %v1190_v4 }
 0x805 PF: > { %p1926_p5 = scmp.eq.s32.totalorder %s1304_s12, 2  ;;  %s1675_s29 = smov [#allocation12]  }
 0x806   : > { %s1210_s30 = sshll.u32 %s1675_s29, 4  ;;  %s1211_s30 = int_to_ptr.vmem [resolvable:$true] %s1210_s30 }
 0x807   : > { %s1548_s3 = scalar_lea.vmem %s1211_s30, 32  ;;  %s1554_s4 = scalar_lea.vmem %s1211_s30, 64 }
 0x808   : > { %p1549_p9 = scmp.ne.s32.totalorder %s1211_s30, %s1548_s3  ;;  %p1555_p12 = scmp.lt.s32.totalorder %s1211_s30, %s1211_s30 }
 0x809   : > { %p1556_p13 = scmp.lt.s32.totalorder %s1554_s4, %s1548_s3 }
 0x80a   : > { %p1550_p10 = pnand %p1549_p9, %p1926_p5 }
 0x80b   : > { %p1557_p0 = por %p1556_p13, %p1555_p12 }
 0x80c   : > { %p1551_p11 = pneg %p1550_p10 }
 0x80e   : > { %p1558_p1 = pnand %p1557_p0, %p1551_p11 }
 0x810   : > { %1561 = shalt.err (!%p1558_p1)
}
 0x811   : > { %1334 = dma.vmem_to_hbm [thread:$0]  (%p1926_p5), %s1211_s30, 32, %s1951_s2, [#allocation9]  }
 0x812 PF: > { %p1355_p6 = scmp.ge.s32.totalorder %s1606_s11, 2  ;;  %p1356_p3 = scmp.eq.s32.totalorder %s1305_s13, 2 }
 0x814   : > { %p1346_p4 = pnand %p1356_p3, %p1355_p6 }
 0x816   : > { %p1347_p7 = pneg %p1346_p4 }
 0x818   : > { %1593 = dma.done.wait (%p1347_p7), [#allocation9], 32  }
 0x819   : > { %1595 = vsyncadd (%p1347_p7), [#allocation9], 4294967264  ;;  %s19_s11 = sadd.s32 1, %s1606_s11   ;;  %s1959_s9 = smov %s1602_s10 }
 0x81a   : > { %p16_p8 = scmp.ge.s32.totalorder %s19_s11, 5   ;;  %s1960_s10 = smov %s1962_s14 }
 0x81c   :  { %18 = sbr.rel (!%p16_p8) target bundleno = 6 (0x6), region = 118 }
 0x821   :  { %1228 = vsyncpa [#allocation8], 1 }
 0x822   :  { %1230 = vsyncpa [#allocation8 + $0x1], 1 }
 0x823   :  { %1231 = vsyncpa [#allocation11], 1 }
 0x824   :  { %1232 = vsyncpa [#allocation9], 1 }
 0x825   :  { %1234 = vsyncpa [#allocation9 + $0x1], 1 }

</bundles_post_ra>
